<compile_context>
chip_gen: v5e
topology: v5e:2x2
jax: 0.10.0
libtpu: 0.0.40
codegen_flags: <defaults>
</compile_context>

<pallas_src>
import jax
import jax.numpy as jnp
from jax.experimental import pallas as pl
from jax.experimental.pallas import tpu as pltpu

_LANE = 128     # lane width (minor dim)
_SUBLANE = 8    # sublane width (second-minor dim)


def _round_up(x, m):
    return (x + m - 1) // m * m


# ----------------------------------------------------------------------------- kernel
def conv_relu_kernel(x_hbm, w_ref, b_ref, o_ref, xbuf, sem):
    """One (image n, H-tile t) grid step.

    x_hbm : (N, H+2, WP+2, Cinp)  padded NHWC activations, left in HBM (pl.ANY).
    w_ref : (9*Cinp, Coutp)       conv taps flattened into the contraction dim.
    b_ref : (1, Coutp)            f32 bias.
    o_ref : (1, 1, TH*WP, Coutp)  lane-dense output slab for this tile.
    xbuf  : (2, TH+2, WP+2, Cinp) VMEM double buffer for the manually DMA'd window.
    sem   : (2,)                  DMA semaphores, one per slot.
    """
    n = pl.program_id(0)
    t = pl.program_id(1)
    num_t = pl.num_programs(1)

    TH = xbuf.shape[1] - 2
    WP = xbuf.shape[2] - 2
    cinp = xbuf.shape[3]
    slot = t % 2

    def start_fetch(tile_idx, s):
        pltpu.make_async_copy(
            x_hbm.at[n, pl.ds(tile_idx * TH, TH + 2)],
            xbuf.at[s],
            sem.at[s],
        ).start()

    # First tile of each image: nobody prefetched it, fetch it now.
    @pl.when(t == 0)
    def _():
        start_fetch(0, 0)

    # Prefetch the next H-tile of this image while we compute the current one
    # (the t axis is 'arbitrary', i.e. sequential per image, so this is safe).
    @pl.when(t + 1 < num_t)
    def _():
        start_fetch(t + 1, 1 - slot)

    # Wait for the current tile's window (issued here at t==0, else at step t-1).
    pltpu.make_async_copy(
        x_hbm.at[n, pl.ds(t * TH, TH + 2)], xbuf.at[slot], sem.at[slot]
    ).wait()

    # im2col once per tile: 9 shifted reads concatenated on the lane axis (Cin is
    # lane-padded so each tap segment is lane-aligned), one reshape (WP is a
    # sublane multiple so the (TH, WP) merge is relayout-free), then a single
    # wide-K MXU matmul with f32 accumulation.
    xs = xbuf.at[slot]
    taps = [xs[dy:dy + TH, dx:dx + WP, :] for dy in range(3) for dx in range(3)]
    patch = jnp.concatenate(taps, axis=-1)          # (TH, WP, 9*Cinp)
    patch = patch.reshape(TH * WP, 9 * cinp)        # (TH*WP, 9*Cinp)

    acc = jnp.dot(patch, w_ref[...], preferred_element_type=jnp.float32)
    acc = acc + b_ref[...]                          # (1, Coutp) f32 broadcast
    o_ref[0, 0] = jnp.maximum(acc, 0.0).astype(o_ref.dtype)


# ------------------------------------------------------------------------ VMEM sizing
def _vmem_capacity_bytes():
    try:
        cap = getattr(pltpu.get_tpu_info(), "vmem_capacity_bytes", None)
        if cap:
            return int(cap)
    except Exception:
        pass
    return 64 * 1024 * 1024  # conservative fallback: v7x per-TensorCore VMEM


def _live_vmem_bytes(th, wp, cinp, coutp, in_isz, out_isz):
    """Per-step live VMEM: 2-slot input window, im2col taps+patch, f32 accumulator,
    single-buffered weight, double-buffered output block, with (8,128) padding."""
    xin = 2 * (th + 2) * _round_up(wp + 2, _SUBLANE) * cinp * in_isz
    patch = 2 * th * wp * 9 * cinp * in_isz          # taps + concatenated patch
    acc = th * wp * coutp * 4                        # f32 accumulator
    wgt = 9 * cinp * coutp * in_isz                  # single-buffered weight
    bias = coutp * 4
    out = 2 * th * wp * coutp * out_isz              # pipelined output block
    return xin + patch + acc + wgt + bias + out


def _pick_h_tile(n_batch, h, wp, cinp, coutp, in_isz, out_isz, budget,
                 min_grid_steps=4):
    """Largest divisor of H fitting the budget, preferring (a) >=min_grid_steps grid
    steps (feeds both v7x TensorCores, leaves pipelining lookahead) and
    (b) MXU-shaped M = TH*WP (multiple of 256)."""
    divisors = [d for d in range(1, h + 1) if h % d == 0]
    fits = [d for d in divisors
            if _live_vmem_bytes(d, wp, cinp, coutp, in_isz, out_isz) <= budget]
    if not fits:
        fits = [1]

    def rank(th):
        m = th * wp
        steps = n_batch * (h // th)
        return (steps >= min_grid_steps, m % 256 == 0, m)

    return max(fits, key=rank)


def _invariant_spec(shape, index_map):
    """BlockSpec for a grid-invariant operand: request a single VMEM buffer instead
    of the default double buffer (reclaims 9*Cinp*Coutp bytes for the weight)."""
    try:
        return pl.BlockSpec(shape, index_map, pipeline_mode=pl.Buffered(1))
    except (TypeError, ValueError):
        return pl.BlockSpec(shape, index_map)


# --------------------------------------------------------------------------- wrapper
def conv_relu(x_nchw, weight, bias, *, h_tile=None, compute_dtype=jnp.bfloat16,
              out_dtype=None):
    """ConvRelu forward: nn.Conv2d(Cin, Cout, 3, padding=1) + ReLU, NCHW in/out.

    compute_dtype: MXU input dtype for activations/weights (default bf16 for
    v6e/v7x peak; accumulation is always f32). Use jnp.float32 / None for full f32.
    out_dtype: dtype of the kernel's HBM output (defaults to x's dtype).
    """
    n_batch, cin, h, w = x_nchw.shape
    cout = weight.shape[0]
    assert weight.shape == (cout, cin, 3, 3) and bias.shape == (cout,)

    out_dtype = x_nchw.dtype if out_dtype is None else out_dtype
    in_dtype = x_nchw.dtype if compute_dtype is None else compute_dtype

    cinp = _round_up(cin, _LANE)      # lane-aligned taps -> aligned vreg concat
    coutp = _round_up(cout, _LANE)    # lane-dense output slab -> unmasked stores
    wp = _round_up(w, _SUBLANE)       # relayout-free (TH, W) -> (TH*W) merge

    in_isz = jnp.dtype(in_dtype).itemsize
    out_isz = jnp.dtype(out_dtype).itemsize

    # Generation-aware VMEM budget (v7x: 64 MiB/TC, v5e/v6e: 128 MiB).
    cap = _vmem_capacity_bytes()
    vmem_limit = min(cap * 3 // 4, 100 * 1024 * 1024)
    budget = int(vmem_limit * 0.55)

    if h_tile is None:
        h_tile = _pick_h_tile(n_batch, h, wp, cinp, coutp, in_isz, out_isz, budget)
    th = h_tile
    assert h % th == 0, "h_tile must divide H"
    n_tiles = h // th

    # ---- wrapper-side layout glue (single fused transpose+pad+cast pass) ----------
    # TODO(synk): in the full UNetResNet decoder, keep activations NHWC with padded
    # channels (and bf16) end-to-end between ConvRelu layers so these NCHW<->NHWC
    # transposes, channel pads and the [:cout] slice are not redone per layer.
    x = jnp.transpose(x_nchw, (0, 2, 3, 1))                              # NHWC
    x = jnp.pad(x, ((0, 0), (1, 1), (1, 1 + wp - w), (0, cinp - cin)))   # halo + align
    x = x.astype(in_dtype)                                               # (N,H+2,WP+2,Cinp)

    w_flat = jnp.transpose(weight, (2, 3, 1, 0))                         # (ky,kx,Cin,Cout)
    w_flat = jnp.pad(w_flat, ((0, 0), (0, 0), (0, cinp - cin), (0, coutp - cout)))
    w_flat = w_flat.reshape(9 * cinp, coutp).astype(in_dtype)
    b_pad = jnp.pad(bias.astype(jnp.float32), (0, coutp - cout)).reshape(1, coutp)

    out = pl.pallas_call(
        conv_relu_kernel,
        out_shape=jax.ShapeDtypeStruct((n_batch, n_tiles, th * wp, coutp), out_dtype),
        grid_spec=pltpu.PrefetchScalarGridSpec(
            num_scalar_prefetch=0,
            grid=(n_batch, n_tiles),
            in_specs=[
                # Activations stay in HBM; the overlapping (TH+2)-row halo window is
                # DMA'd manually per step (no halo-duplicated HBM copy in the wrapper).
                pl.BlockSpec(memory_space=pl.ANY),
                _invariant_spec((9 * cinp, coutp), lambda n, t: (0, 0)),
                _invariant_spec((1, coutp), lambda n, t: (0, 0)),
            ],
            out_specs=pl.BlockSpec((1, 1, th * wp, coutp), lambda n, t: (n, t, 0, 0)),
            scratch_shapes=[
                pltpu.VMEM((2, th + 2, wp + 2, cinp), in_dtype),
                pltpu.SemaphoreType.DMA((2,)),
            ],
        ),
        compiler_params=pltpu.CompilerParams(
            # Images shard across v7x's two TensorCores; H-tiles run sequentially
            # per image so the cross-step input prefetch is valid.
            dimension_semantics=("parallel", "arbitrary"),
            vmem_limit_bytes=int(vmem_limit),
        ),
    )(x, w_flat, b_pad)

    # (N, T, TH*WP, Coutp) -> (N, H, W, Cout) -> NCHW to match the PyTorch API.
    # TODO(synk): for small-Cout mem-bound layers the Coutp write amplification can
    # matter; an unpadded-Cout output block (masked stores) is the alternative there.
    # TODO(synk): for the largest decoder layers add a Cout grid axis (weight tiled
    # over output channels) when the weight block alone exceeds the VMEM budget.
    out = out.reshape(n_batch, n_tiles, th, wp, coutp)[:, :, :, :w, :cout]
    out = out.reshape(n_batch, h, w, cout)
    return jnp.transpose(out, (0, 3, 1, 2))


# ------------------------------------------------------------------------------ demo
if __name__ == "__main__":
    key = jax.random.PRNGKey(0)
    k_x, k_w, k_b = jax.random.split(key, 3)

    N, Cin, Cout, H, W = 2, 4, 8, 16, 16

    x = jax.random.normal(k_x, (N, Cin, H, W), dtype=jnp.float32)
    # Init mimicking nn.Conv2d's uniform(-1/sqrt(fan_in), 1/sqrt(fan_in)).
    fan_in = Cin * 3 * 3
    bound = 1.0 / (fan_in ** 0.5)
    weight = jax.random.uniform(
        k_w, (Cout, Cin, 3, 3), minval=-bound, maxval=bound, dtype=jnp.float32
    )
    bias = jax.random.uniform(
        k_b, (Cout,), minval=-bound, maxval=bound, dtype=jnp.float32
    )

    # Reference: XLA conv (same semantics as torch F.conv2d, padding=1) + ReLU.
    ref = jax.lax.conv_general_dilated(
        x, weight, window_strides=(1, 1), padding=((1, 1), (1, 1)),
        dimension_numbers=("NCHW", "OIHW", "NCHW"),
    ) + bias[None, :, None, None]
    ref = jnp.maximum(ref, 0.0)

    # f32 compute path, explicit h_tile=8 exercises the H-tiling + halo DMA
    # (grid = 2 images x 2 tiles = 4 steps). Tight tolerance.
    out_f32 = jax.block_until_ready(
        conv_relu(x, weight, bias, h_tile=8, compute_dtype=jnp.float32))
    assert out_f32.shape == (N, Cout, H, W)
    err_f32 = float(jnp.max(jnp.abs(out_f32 - ref)))
    assert err_f32 < 1e-4, err_f32

    # Default bf16-MXU path with the automatic tile picker; bf16-level tolerance.
    out_bf16 = jax.block_until_ready(conv_relu(x, weight, bias))
    assert out_bf16.shape == (N, Cout, H, W)
    err_bf16 = float(jnp.max(jnp.abs(out_bf16 - ref)))
    assert err_bf16 < 5e-2, err_bf16

    print("KERNEL_OK")
</pallas_src>

<mosaic_0001>
module attributes {stable_mosaic.version = 11 : i64} {
  func.func @conv_relu_kernel(%arg0: i32, %arg1: i32, %arg2: memref<2x18x18x128xf32, #tpu.memory_space<any>>, %arg3: memref<1152x128xf32, #tpu.memory_space<vmem>>, %arg4: memref<1x128xf32, #tpu.memory_space<vmem>>, %arg5: memref<1x1x128x128xf32, #tpu.memory_space<vmem>>, %arg6: memref<2x10x18x128xf32, #tpu.memory_space<vmem>>, %arg7: memref<2x!tpu.dma_semaphore, #tpu.memory_space<semaphore_mem>>) attributes {dimension_semantics = [#tpu.dimension_semantics<parallel>, #tpu.dimension_semantics<arbitrary>], iteration_bounds = array<i64: 2, 2>, scalar_prefetch = 0 : i64, scratch_operands = 2 : i64, tpu.core_type = #tpu.core_type<tc>, window_params = [{}, {pipeline_mode = #tpu.pipeline_mode<synchronous>, transform_indices = @transform_1, window_bounds = array<i64: 1152, 128>}, {pipeline_mode = #tpu.pipeline_mode<synchronous>, transform_indices = @transform_2, window_bounds = array<i64: 1, 128>}, {transform_indices = @transform_3, window_bounds = array<i64: 1, 1, 128, 128>}]} {
    %c2_i32 = arith.constant 2 : i32
    %c0_i32 = arith.constant 0 : i32
    %0 = arith.cmpi eq, %c2_i32, %c0_i32 : i32
    %c1_i32 = arith.constant 1 : i32
    %1 = arith.select %0, %c1_i32, %c2_i32 : i32
    %2 = arith.remsi %arg1, %1 : i32
    %c0_i32_0 = arith.constant 0 : i32
    %3 = arith.cmpi ne, %2, %c0_i32_0 : i32
    %c0_i32_1 = arith.constant 0 : i32
    %4 = arith.cmpi slt, %2, %c0_i32_1 : i32
    %c0_i32_2 = arith.constant 0 : i32
    %5 = arith.cmpi slt, %1, %c0_i32_2 : i32
    %6 = arith.xori %4, %5 : i1
    %7 = arith.andi %6, %3 : i1
    %8 = arith.addi %2, %1 : i32
    %9 = arith.select %7, %8, %2 : i32
    %c0_i32_3 = arith.constant 0 : i32
    %10 = arith.cmpi eq, %arg1, %c0_i32_3 : i32
    %11 = arith.extui %10 : i1 to i32
    %c0_i32_4 = arith.constant 0 : i32
    %12 = arith.cmpi ne, %11, %c0_i32_4 : i32
    scf.if %12 {
      %c0_i32_73 = arith.constant 0 : i32
      %c0_i32_74 = arith.constant 0 : i32
      %c0_i32_75 = arith.constant 0 : i32
      %c0_i32_76 = arith.constant 0 : i32
      %c0_i32_77 = arith.constant 0 : i32
      %63 = tpu.memref_slice %arg2[%arg0, %c0_i32_75, %c0_i32_76, %c0_i32_77] : memref<2x18x18x128xf32, #tpu.memory_space<any>> -> memref<1x10x18x128xf32, #tpu.memory_space<any>>
      %64 = tpu.memref_squeeze %63 : memref<1x10x18x128xf32, #tpu.memory_space<any>> -> memref<10x18x128xf32, #tpu.memory_space<any>>
      %c0_i32_78 = arith.constant 0 : i32
      %c0_i32_79 = arith.constant 0 : i32
      %c0_i32_80 = arith.constant 0 : i32
      %65 = tpu.memref_slice %arg6[%c0_i32_73, %c0_i32_78, %c0_i32_79, %c0_i32_80] : memref<2x10x18x128xf32, #tpu.memory_space<vmem>> -> memref<1x10x18x128xf32, #tpu.memory_space<vmem>>
      %66 = tpu.memref_squeeze %65 : memref<1x10x18x128xf32, #tpu.memory_space<vmem>> -> memref<10x18x128xf32, #tpu.memory_space<vmem>>
      %67 = tpu.memref_slice %arg7[%c0_i32_74] : memref<2x!tpu.dma_semaphore, #tpu.memory_space<semaphore_mem>> -> memref<1x!tpu.dma_semaphore, #tpu.memory_space<semaphore_mem>>
      %68 = tpu.memref_squeeze %67 : memref<1x!tpu.dma_semaphore, #tpu.memory_space<semaphore_mem>> -> memref<!tpu.dma_semaphore, #tpu.memory_space<semaphore_mem>>
      tpu.enqueue_dma source(%64 : memref<10x18x128xf32, #tpu.memory_space<any>>) target(%66 : memref<10x18x128xf32, #tpu.memory_space<vmem>>) target_semaphore(%68 : memref<!tpu.dma_semaphore, #tpu.memory_space<semaphore_mem>>)
    } else {
    }
    %c1_i32_5 = arith.constant 1 : i32
    %13 = arith.addi %arg1, %c1_i32_5 : i32
    %c2_i32_6 = arith.constant 2 : i32
    %14 = arith.cmpi slt, %13, %c2_i32_6 : i32
    %15 = arith.extui %14 : i1 to i32
    %c0_i32_7 = arith.constant 0 : i32
    %16 = arith.cmpi ne, %15, %c0_i32_7 : i32
    scf.if %16 {
      %c1_i32_73 = arith.constant 1 : i32
      %63 = arith.addi %arg1, %c1_i32_73 : i32
      %c1_i32_74 = arith.constant 1 : i32
      %64 = arith.subi %c1_i32_74, %9 : i32
      %c8_i32_75 = arith.constant 8 : i32
      %65 = arith.muli %63, %c8_i32_75 : i32
      %c0_i32_76 = arith.constant 0 : i32
      %c0_i32_77 = arith.constant 0 : i32
      %66 = tpu.memref_slice %arg2[%arg0, %65, %c0_i32_76, %c0_i32_77] : memref<2x18x18x128xf32, #tpu.memory_space<any>> -> memref<1x10x18x128xf32, #tpu.memory_space<any>>
      %67 = tpu.memref_squeeze %66 : memref<1x10x18x128xf32, #tpu.memory_space<any>> -> memref<10x18x128xf32, #tpu.memory_space<any>>
      %c0_i32_78 = arith.constant 0 : i32
      %c0_i32_79 = arith.constant 0 : i32
      %c0_i32_80 = arith.constant 0 : i32
      %68 = tpu.memref_slice %arg6[%64, %c0_i32_78, %c0_i32_79, %c0_i32_80] : memref<2x10x18x128xf32, #tpu.memory_space<vmem>> -> memref<1x10x18x128xf32, #tpu.memory_space<vmem>>
      %69 = tpu.memref_squeeze %68 : memref<1x10x18x128xf32, #tpu.memory_space<vmem>> -> memref<10x18x128xf32, #tpu.memory_space<vmem>>
      %70 = tpu.memref_slice %arg7[%64] : memref<2x!tpu.dma_semaphore, #tpu.memory_space<semaphore_mem>> -> memref<1x!tpu.dma_semaphore, #tpu.memory_space<semaphore_mem>>
      %71 = tpu.memref_squeeze %70 : memref<1x!tpu.dma_semaphore, #tpu.memory_space<semaphore_mem>> -> memref<!tpu.dma_semaphore, #tpu.memory_space<semaphore_mem>>
      tpu.enqueue_dma source(%67 : memref<10x18x128xf32, #tpu.memory_space<any>>) target(%69 : memref<10x18x128xf32, #tpu.memory_space<vmem>>) target_semaphore(%71 : memref<!tpu.dma_semaphore, #tpu.memory_space<semaphore_mem>>)
    } else {
    }
    %c8_i32 = arith.constant 8 : i32
    %17 = arith.muli %arg1, %c8_i32 : i32
    %c0_i32_8 = arith.constant 0 : i32
    %c0_i32_9 = arith.constant 0 : i32
    %18 = tpu.memref_slice %arg2[%arg0, %17, %c0_i32_8, %c0_i32_9] : memref<2x18x18x128xf32, #tpu.memory_space<any>> -> memref<1x10x18x128xf32, #tpu.memory_space<any>>
    %19 = tpu.memref_squeeze %18 : memref<1x10x18x128xf32, #tpu.memory_space<any>> -> memref<10x18x128xf32, #tpu.memory_space<any>>
    %c0_i32_10 = arith.constant 0 : i32
    %c0_i32_11 = arith.constant 0 : i32
    %c0_i32_12 = arith.constant 0 : i32
    %20 = tpu.memref_slice %arg6[%9, %c0_i32_10, %c0_i32_11, %c0_i32_12] : memref<2x10x18x128xf32, #tpu.memory_space<vmem>> -> memref<1x10x18x128xf32, #tpu.memory_space<vmem>>
    %21 = tpu.memref_squeeze %20 : memref<1x10x18x128xf32, #tpu.memory_space<vmem>> -> memref<10x18x128xf32, #tpu.memory_space<vmem>>
    %22 = tpu.memref_slice %arg7[%9] : memref<2x!tpu.dma_semaphore, #tpu.memory_space<semaphore_mem>> -> memref<1x!tpu.dma_semaphore, #tpu.memory_space<semaphore_mem>>
    %23 = tpu.memref_squeeze %22 : memref<1x!tpu.dma_semaphore, #tpu.memory_space<semaphore_mem>> -> memref<!tpu.dma_semaphore, #tpu.memory_space<semaphore_mem>>
    tpu.wait_dma2 semaphore(%23 : memref<!tpu.dma_semaphore, #tpu.memory_space<semaphore_mem>>) src(%19 : memref<10x18x128xf32, #tpu.memory_space<any>>) dst(%21 : memref<10x18x128xf32, #tpu.memory_space<vmem>>)
    %c0_i32_13 = arith.constant 0 : i32
    %c0_i32_14 = arith.constant 0 : i32
    %c0_i32_15 = arith.constant 0 : i32
    %24 = tpu.memref_slice %arg6[%9, %c0_i32_13, %c0_i32_14, %c0_i32_15] : memref<2x10x18x128xf32, #tpu.memory_space<vmem>> -> memref<1x10x18x128xf32, #tpu.memory_space<vmem>>
    %25 = tpu.memref_squeeze %24 : memref<1x10x18x128xf32, #tpu.memory_space<vmem>> -> memref<10x18x128xf32, #tpu.memory_space<vmem>>
    %c0 = arith.constant 0 : index
    %c0_16 = arith.constant 0 : index
    %c0_17 = arith.constant 0 : index
    %26 = vector.load %25[%c0, %c0_16, %c0_17] : memref<10x18x128xf32, #tpu.memory_space<vmem>>, vector<8x16x128xf32>
    %c0_i32_18 = arith.constant 0 : i32
    %c0_i32_19 = arith.constant 0 : i32
    %c0_i32_20 = arith.constant 0 : i32
    %27 = tpu.memref_slice %arg6[%9, %c0_i32_18, %c0_i32_19, %c0_i32_20] : memref<2x10x18x128xf32, #tpu.memory_space<vmem>> -> memref<1x10x18x128xf32, #tpu.memory_space<vmem>>
    %28 = tpu.memref_squeeze %27 : memref<1x10x18x128xf32, #tpu.memory_space<vmem>> -> memref<10x18x128xf32, #tpu.memory_space<vmem>>
    %c0_21 = arith.constant 0 : index
    %c1 = arith.constant 1 : index
    %c0_22 = arith.constant 0 : index
    %29 = vector.load %28[%c0_21, %c1, %c0_22] : memref<10x18x128xf32, #tpu.memory_space<vmem>>, vector<8x16x128xf32>
    %c0_i32_23 = arith.constant 0 : i32
    %c0_i32_24 = arith.constant 0 : i32
    %c0_i32_25 = arith.constant 0 : i32
    %30 = tpu.memref_slice %arg6[%9, %c0_i32_23, %c0_i32_24, %c0_i32_25] : memref<2x10x18x128xf32, #tpu.memory_space<vmem>> -> memref<1x10x18x128xf32, #tpu.memory_space<vmem>>
    %31 = tpu.memref_squeeze %30 : memref<1x10x18x128xf32, #tpu.memory_space<vmem>> -> memref<10x18x128xf32, #tpu.memory_space<vmem>>
    %c0_26 = arith.constant 0 : index
    %c2 = arith.constant 2 : index
    %c0_27 = arith.constant 0 : index
    %32 = vector.load %31[%c0_26, %c2, %c0_27] : memref<10x18x128xf32, #tpu.memory_space<vmem>>, vector<8x16x128xf32>
    %c0_i32_28 = arith.constant 0 : i32
    %c0_i32_29 = arith.constant 0 : i32
    %c0_i32_30 = arith.constant 0 : i32
    %33 = tpu.memref_slice %arg6[%9, %c0_i32_28, %c0_i32_29, %c0_i32_30] : memref<2x10x18x128xf32, #tpu.memory_space<vmem>> -> memref<1x10x18x128xf32, #tpu.memory_space<vmem>>
    %34 = tpu.memref_squeeze %33 : memref<1x10x18x128xf32, #tpu.memory_space<vmem>> -> memref<10x18x128xf32, #tpu.memory_space<vmem>>
    %c1_31 = arith.constant 1 : index
    %c0_32 = arith.constant 0 : index
    %c0_33 = arith.constant 0 : index
    %35 = vector.load %34[%c1_31, %c0_32, %c0_33] : memref<10x18x128xf32, #tpu.memory_space<vmem>>, vector<8x16x128xf32>
    %c0_i32_34 = arith.constant 0 : i32
    %c0_i32_35 = arith.constant 0 : i32
    %c0_i32_36 = arith.constant 0 : i32
    %36 = tpu.memref_slice %arg6[%9, %c0_i32_34, %c0_i32_35, %c0_i32_36] : memref<2x10x18x128xf32, #tpu.memory_space<vmem>> -> memref<1x10x18x128xf32, #tpu.memory_space<vmem>>
    %37 = tpu.memref_squeeze %36 : memref<1x10x18x128xf32, #tpu.memory_space<vmem>> -> memref<10x18x128xf32, #tpu.memory_space<vmem>>
    %c1_37 = arith.constant 1 : index
    %c1_38 = arith.constant 1 : index
    %c0_39 = arith.constant 0 : index
    %38 = vector.load %37[%c1_37, %c1_38, %c0_39] : memref<10x18x128xf32, #tpu.memory_space<vmem>>, vector<8x16x128xf32>
    %c0_i32_40 = arith.constant 0 : i32
    %c0_i32_41 = arith.constant 0 : i32
    %c0_i32_42 = arith.constant 0 : i32
    %39 = tpu.memref_slice %arg6[%9, %c0_i32_40, %c0_i32_41, %c0_i32_42] : memref<2x10x18x128xf32, #tpu.memory_space<vmem>> -> memref<1x10x18x128xf32, #tpu.memory_space<vmem>>
    %40 = tpu.memref_squeeze %39 : memref<1x10x18x128xf32, #tpu.memory_space<vmem>> -> memref<10x18x128xf32, #tpu.memory_space<vmem>>
    %c1_43 = arith.constant 1 : index
    %c2_44 = arith.constant 2 : index
    %c0_45 = arith.constant 0 : index
    %41 = vector.load %40[%c1_43, %c2_44, %c0_45] : memref<10x18x128xf32, #tpu.memory_space<vmem>>, vector<8x16x128xf32>
    %c0_i32_46 = arith.constant 0 : i32
    %c0_i32_47 = arith.constant 0 : i32
    %c0_i32_48 = arith.constant 0 : i32
    %42 = tpu.memref_slice %arg6[%9, %c0_i32_46, %c0_i32_47, %c0_i32_48] : memref<2x10x18x128xf32, #tpu.memory_space<vmem>> -> memref<1x10x18x128xf32, #tpu.memory_space<vmem>>
    %43 = tpu.memref_squeeze %42 : memref<1x10x18x128xf32, #tpu.memory_space<vmem>> -> memref<10x18x128xf32, #tpu.memory_space<vmem>>
    %c2_49 = arith.constant 2 : index
    %c0_50 = arith.constant 0 : index
    %c0_51 = arith.constant 0 : index
    %44 = vector.load %43[%c2_49, %c0_50, %c0_51] : memref<10x18x128xf32, #tpu.memory_space<vmem>>, vector<8x16x128xf32>
    %c0_i32_52 = arith.constant 0 : i32
    %c0_i32_53 = arith.constant 0 : i32
    %c0_i32_54 = arith.constant 0 : i32
    %45 = tpu.memref_slice %arg6[%9, %c0_i32_52, %c0_i32_53, %c0_i32_54] : memref<2x10x18x128xf32, #tpu.memory_space<vmem>> -> memref<1x10x18x128xf32, #tpu.memory_space<vmem>>
    %46 = tpu.memref_squeeze %45 : memref<1x10x18x128xf32, #tpu.memory_space<vmem>> -> memref<10x18x128xf32, #tpu.memory_space<vmem>>
    %c2_55 = arith.constant 2 : index
    %c1_56 = arith.constant 1 : index
    %c0_57 = arith.constant 0 : index
    %47 = vector.load %46[%c2_55, %c1_56, %c0_57] : memref<10x18x128xf32, #tpu.memory_space<vmem>>, vector<8x16x128xf32>
    %c0_i32_58 = arith.constant 0 : i32
    %c0_i32_59 = arith.constant 0 : i32
    %c0_i32_60 = arith.constant 0 : i32
    %48 = tpu.memref_slice %arg6[%9, %c0_i32_58, %c0_i32_59, %c0_i32_60] : memref<2x10x18x128xf32, #tpu.memory_space<vmem>> -> memref<1x10x18x128xf32, #tpu.memory_space<vmem>>
    %49 = tpu.memref_squeeze %48 : memref<1x10x18x128xf32, #tpu.memory_space<vmem>> -> memref<10x18x128xf32, #tpu.memory_space<vmem>>
    %c2_61 = arith.constant 2 : index
    %c2_62 = arith.constant 2 : index
    %c0_63 = arith.constant 0 : index
    %50 = vector.load %49[%c2_61, %c2_62, %c0_63] : memref<10x18x128xf32, #tpu.memory_space<vmem>>, vector<8x16x128xf32>
    %51 = tpu.concatenate %26, %29, %32, %35, %38, %41, %44, %47, %50 in 2 : vector<8x16x128xf32>, vector<8x16x128xf32>, vector<8x16x128xf32>, vector<8x16x128xf32>, vector<8x16x128xf32>, vector<8x16x128xf32>, vector<8x16x128xf32>, vector<8x16x128xf32>, vector<8x16x128xf32> -> vector<8x16x1152xf32>
    %52 = vector.shape_cast %51 : vector<8x16x1152xf32> to vector<128x1152xf32>
    %c0_64 = arith.constant 0 : index
    %c0_65 = arith.constant 0 : index
    %53 = vector.load %arg3[%c0_64, %c0_65] : memref<1152x128xf32, #tpu.memory_space<vmem>>, vector<1152x128xf32>
    %cst = arith.constant dense<0.000000e+00> : vector<128x128xf32>
    %54 = tpu.matmul %52, %53, %cst {dimension_numbers = #tpu.dot_dimension_numbers<[1], [0], [0], [1], [0, 0, 1, 1], [], []>} : vector<128x1152xf32>, vector<1152x128xf32>, vector<128x128xf32> -> vector<128x128xf32>
    %c0_66 = arith.constant 0 : index
    %c0_67 = arith.constant 0 : index
    %55 = vector.load %arg4[%c0_66, %c0_67] : memref<1x128xf32, #tpu.memory_space<vmem>>, vector<1x128xf32>
    %56 = vector.broadcast %55 : vector<1x128xf32> to vector<128x128xf32>
    %57 = arith.addf %54, %56 : vector<128x128xf32>
    %cst_68 = arith.constant 0.000000e+00 : f32
    %58 = vector.broadcast %cst_68 : f32 to vector<128x128xf32>
    %59 = arith.maximumf %57, %58 : vector<128x128xf32>
    %c0_69 = arith.constant 0 : index
    %c0_70 = arith.constant 0 : index
    %c0_71 = arith.constant 0 : index
    %c0_72 = arith.constant 0 : index
    %60 = vector.load %arg5[%c0_69, %c0_70, %c0_71, %c0_72] : memref<1x1x128x128xf32, #tpu.memory_space<vmem>>, vector<1x1x128x128xf32>
    %61 = vector.shape_cast %60 : vector<1x1x128x128xf32> to vector<128x128xf32>
    %62 = vector.shape_cast %59 : vector<128x128xf32> to vector<1x1x128x128xf32>
    tpu.vector_store %arg5[%c0_69, %c0_70, %c0_71, %c0_72], %62 {strides = array<i32>} : memref<1x1x128x128xf32, #tpu.memory_space<vmem>>, vector<1x1x128x128xf32>,
    return
  }
  func.func @transform_1(%arg0: i32, %arg1: i32) -> (i32, i32) {
    %c0_i32 = arith.constant 0 : i32
    %c0_i32_0 = arith.constant 0 : i32
    %c0_i32_1 = arith.constant 0 : i32
    return %c0_i32, %c0_i32_0 : i32, i32
  }
  func.func @transform_2(%arg0: i32, %arg1: i32) -> (i32, i32) {
    %c0_i32 = arith.constant 0 : i32
    %c0_i32_0 = arith.constant 0 : i32
    %c0_i32_1 = arith.constant 0 : i32
    return %c0_i32, %c0_i32_0 : i32, i32
  }
  func.func @transform_3(%arg0: i32, %arg1: i32) -> (i32, i32, i32, i32) {
    %c0_i32 = arith.constant 0 : i32
    %c0_i32_0 = arith.constant 0 : i32
    %c0_i32_1 = arith.constant 0 : i32
    return %arg0, %arg1, %c0_i32, %c0_i32_0 : i32, i32, i32, i32
  }
}

</mosaic_0001>

<bundles_post_ra>
// kernel: tpu_custom_call.1
= control target key start
LH: loop header
LB: loop body
LE: loop exit
PB: predicated region body
PF: predicated region fallthrough
CT: control target
= control target key end

     0   :  { %8 = vsyncpa [#allocation5], 0  ;;  %s2874_s0 = inlined_call_operand.vmem [shape: f32[2,18,18,128], index: 0, kind: input, shape index: {}]   ;;  %s2875_s1 = inlined_call_operand.vmem [shape: f32[1152,128], index: 1, kind: input, shape index: {}]   ;;  %s2876_s2 = inlined_call_operand.vmem [shape: f32[1,128], index: 2, kind: input, shape index: {}]   ;;  %s2877_s3 = inlined_call_operand.hbm [shape: f32[2,2,128,128], index: 3, kind: output, shape index: {}]  }
   0x1   :  { %10 = vsyncpa [#allocation5 + $0x1], 0  ;;  %s1790_s12 = smov 0   ;;  %s1792_s13 = smov 0  }
   0x2   :  { %s1794_s14 = smov 0   ;;  %s1796_s15 = smov 0  }
   0x3   :  { %s1798_s16 = smov 0   ;;  %s1800_s17 = smov 0  }
   0x4   :  { %s1802_s18 = smov 0   ;;  %s1804_s19 = smov 0  }
   0x5 LB: > { %s1384_s20 = sadd.s32 4294967295, %s1766_s19   ;;  %s1385_s21 = sadd.s32 4294967294, %s1766_s19   ;;  %s1766_s19 = sphi %s1804_s19, %s16_s19   ;;  %s1762_s18 = sphi %s1802_s18, %s2886_s18   ;;  %s1758_s17 = sphi %s1800_s17, %s2885_s17   ;;  %s1754_s16 = sphi %s1798_s16, %s2884_s16   ;;  %s1750_s15 = sphi %s1796_s15, %s2883_s15   ;;  %s1746_s14 = sphi %s1794_s14, %s2882_s14   ;;  %s1742_s13 = sphi %s1792_s13, %s2881_s13   ;;  %s1738_s12 = sphi %s1790_s12, %s2880_s12  }
   0x6   : > { %s25_s22 = sadd.s32 1, %s1758_s17  ;;  %s28_s23 = sadd.s32 1, %s1762_s18 }
   0x7   : > { %p26_p0 = scmp.ge.s32.totalorder %s25_s22, 2  ;;  %p89_p1 = scmp.ne.s32.totalorder %s1746_s14, %s1742_s13 }
   0x8   : > { %p90_p2 = scmp.eq.s32.totalorder %s1384_s20, 3  ;;  %p95_p5 = scmp.ne.s32.totalorder %s1742_s13, %s1738_s12 }
   0x9   : > { %s2888_s22 = smov (%p26_p0, %s25_s22), 0  ;;  %s2890_s23 = smov (!%p26_p0, %s28_s23), %s1762_s18 }
   0xa   : > { %s75_s24 = ssub.s32 %s1758_s17, %s2888_s22  ;;  %p1841_p3 = por %p90_p2, %p89_p1 }
   0xb   : > { %p30_p4 = scmp.ge.s32.totalorder %s2890_s23, 2  ;;  %p96_p6 = scmp.eq.s32.totalorder %s1385_s21, 3 }
   0xc   : > { %p1387_p7 = scmp.ge.s32.totalorder %s1766_s19, 1  ;;  %p120_p9 = scmp.lt.s32.totalorder %s1766_s19, 5 }
   0xd   : > { %s2892_s23 = smov (%p30_p4, %s2890_s23), 0  ;;  %p1850_p8 = por %p96_p6, %p95_p5 }
   0xe   : > { %s74_s27 = ssub.s32 %s1762_s18, %s2892_s23  ;;  %s79_s28 = sadd.s32 1, %s1746_s14 }
   0xf   : > { %s76_s29 = sor.u32 %s75_s24, %s74_s27  ;;  %p121_p10 = pnand %p1387_p7, %p120_p9 }
  0x10   : > { %p77_p11 = scmp.eq.s32.totalorder %s76_s29, 0  ;;  %s134_s4 = sand.u32 (!%p121_p10), 1, %s1742_s13  }
  0x11   : > { %124 = sbr.rel (%p121_p10) target bundleno = 566 (0x236), region = 28  ;;  %p137_p12 = scmp.lt.s32.totalorder (!%p121_p10), %s1750_s15, 0 }
  0x12   : > { %s1859_s30 = scalar_select %p77_p11, %s1746_s14, %s79_s28  }
  0x13   : > { %s1388_s5 = sshll.u32 (!%p121_p10), %s134_s4, 7  ;;  %s138_s6 = ssub.s32 (!%p121_p10), 0, %s1750_s15 }
  0x14   : > { %s1389_s7 = smin.u32 (!%p121_p10), %s1750_s15, %s138_s6  ;;  %s1869_s11 = scalar_lea.vmem (!%p121_p10), [#allocation4], %s1388_s5 }
  0x15   : > { %s140_s8 = sand.u32 (!%p121_p10), 1, %s1389_s7   ;;  %p1392_p0 = scmp.ne.s32.totalorder (!%p121_p10), %s1750_s15, 0 }
  0x16   : > { %s141_s9 = ssub.s32 0, %s140_s8  ;;  %s153_s20 = smul.u32 (!%p1392_p0), 432, %s1754_s16 }
  0x17   : > { %s2894_s9 = smov (!%p137_p12, %s141_s9), %s140_s8  ;;  %152 = sbr.rel (%p1392_p0) target bundleno = 60 (0x3c), region = 32 }
  0x18   : > { %p1391_p13 = scmp.lt.s32.totalorder %s2894_s9, 0  ;;  %s147_s10 = sadd.s32 2, %s2894_s9 }
  0x19   : > { %s1876_s27 = scalar_lea.vmem (!%p1392_p0), %s2874_s0, %s153_s20 }
  0x1a   : > { %s2896_s10 = smov (!%p1391_p13, %s147_s10), %s2894_s9 }
  0x1c   : > { %v167_v0 = vld [vmem:[%s1876_s27] sm:$0xff]  ;;  %v169_v1 = vld [vmem:[%s1876_s27 + $0x8] sm:$0xff]  ;;  %v171_v2 = vld [vmem:[%s1876_s27 + $0x18] sm:$0xff] }
  0x1d   : > { %168 = vst [vmem:[#allocation2] sm:$0xff] %v167_v0  ;;  %v173_v3 = vld [vmem:[%s1876_s27 + $0x20] sm:$0xff]  ;;  %v175_v4 = vld [vmem:[%s1876_s27 + $0x30] sm:$0xff]  ;;  %v177_v5 = vld [vmem:[%s1876_s27 + $0x38] sm:$0xff] }
  0x1e   : > { %170 = vst [vmem:[#allocation2 + $0x8] sm:$0xff] %v169_v1  ;;  %v179_v6 = vld [vmem:[%s1876_s27 + $0x48] sm:$0xff]  ;;  %v181_v7 = vld [vmem:[%s1876_s27 + $0x50] sm:$0xff]  ;;  %v183_v8 = vld [vmem:[%s1876_s27 + $0x60] sm:$0xff] }
  0x1f   : > { %172 = vst [vmem:[#allocation2 + $0x18] sm:$0xff] %v171_v2  ;;  %v185_v9 = vld [vmem:[%s1876_s27 + $0x68] sm:$0xff]  ;;  %v187_v10 = vld [vmem:[%s1876_s27 + $0x78] sm:$0xff]  ;;  %v189_v11 = vld [vmem:[%s1876_s27 + $0x80] sm:$0xff] }
  0x20   : > { %174 = vst [vmem:[#allocation2 + $0x20] sm:$0xff] %v173_v3  ;;  %v191_v12 = vld [vmem:[%s1876_s27 + $0x90] sm:$0xff]  ;;  %v193_v13 = vld [vmem:[%s1876_s27 + $0x98] sm:$0xff]  ;;  %v195_v14 = vld [vmem:[%s1876_s27 + $0xa8] sm:$0xff] }
  0x21   : > { %176 = vst [vmem:[#allocation2 + $0x30] sm:$0xff] %v175_v4  ;;  %v197_v15 = vld [vmem:[%s1876_s27 + $0xb0] sm:$0xff]  ;;  %v199_v16 = vld [vmem:[%s1876_s27 + $0xc0] sm:$0xff]  ;;  %v201_v17 = vld [vmem:[%s1876_s27 + $0xc8] sm:$0xff] }
  0x22   : > { %178 = vst [vmem:[#allocation2 + $0x38] sm:$0xff] %v177_v5  ;;  %v203_v18 = vld [vmem:[%s1876_s27 + $0xd8] sm:$0xff]  ;;  %v205_v19 = vld [vmem:[%s1876_s27 + $0xe0] sm:$0xff]  ;;  %v1393_v20 = vld [vmem:[%s1876_s27 + $0x10] sm:$0x3] }
  0x23   : > { %180 = vst [vmem:[#allocation2 + $0x48] sm:$0xff] %v179_v6  ;;  %v1394_v21 = vld [vmem:[%s1876_s27 + $0x28] sm:$0x3]  ;;  %v1395_v22 = vld [vmem:[%s1876_s27 + $0x40] sm:$0x3] }
  0x24   : > { %182 = vst [vmem:[#allocation2 + $0x50] sm:$0xff] %v181_v7  ;;  %v1396_v23 = vld [vmem:[%s1876_s27 + $0x58] sm:$0x3]  ;;  %v1397_v24 = vld [vmem:[%s1876_s27 + $0x70] sm:$0x3] }
  0x25   : > { %184 = vst [vmem:[#allocation2 + $0x60] sm:$0xff] %v183_v8  ;;  %v1398_v25 = vld [vmem:[%s1876_s27 + $0x88] sm:$0x3]  ;;  %v1399_v26 = vld [vmem:[%s1876_s27 + $0xa0] sm:$0x3] }
  0x26   : > { %186 = vst [vmem:[#allocation2 + $0x68] sm:$0xff] %v185_v9  ;;  %v1400_v27 = vld [vmem:[%s1876_s27 + $0xb8] sm:$0x3]  ;;  %v1401_v28 = vld [vmem:[%s1876_s27 + $0xd0] sm:$0x3] }
  0x27   : > { %188 = vst [vmem:[#allocation2 + $0x78] sm:$0xff] %v187_v10  ;;  %v1402_v29 = vld [vmem:[%s1876_s27 + $0xe8] sm:$0x3] }
  0x28   : > { %190 = vst [vmem:[#allocation2 + $0x80] sm:$0xff] %v189_v11 }
  0x29   : > { %192 = vst [vmem:[#allocation2 + $0x90] sm:$0xff] %v191_v12 }
  0x2a   : > { %194 = vst [vmem:[#allocation2 + $0x98] sm:$0xff] %v193_v13 }
  0x2b   : > { %196 = vst [vmem:[#allocation2 + $0xa8] sm:$0xff] %v195_v14 }
  0x2c   : > { %198 = vst [vmem:[#allocation2 + $0xb0] sm:$0xff] %v197_v15 }
  0x2d   : > { %200 = vst [vmem:[#allocation2 + $0xc0] sm:$0xff] %v199_v16 }
  0x2e   : > { %202 = vst [vmem:[#allocation2 + $0xc8] sm:$0xff] %v201_v17 }
  0x2f   : > { %204 = vst [vmem:[#allocation2 + $0xd8] sm:$0xff] %v203_v18 }
  0x30   : > { %206 = vst [vmem:[#allocation2 + $0xe0] sm:$0xff] %v205_v19 }
  0x31   : > { %218 = vst [vmem:[#allocation2 + $0x10] sm:$0x3] %v1393_v20 }
  0x32   : > { %220 = vst [vmem:[#allocation2 + $0x28] sm:$0x3] %v1394_v21 }
  0x33   : > { %222 = vst [vmem:[#allocation2 + $0x40] sm:$0x3] %v1395_v22 }
  0x34   : > { %224 = vst [vmem:[#allocation2 + $0x58] sm:$0x3] %v1396_v23 }
  0x35   : > { %226 = vst [vmem:[#allocation2 + $0x70] sm:$0x3] %v1397_v24 }
  0x36   : > { %228 = vst [vmem:[#allocation2 + $0x88] sm:$0x3] %v1398_v25 }
  0x37   : > { %230 = vst [vmem:[#allocation2 + $0xa0] sm:$0x3] %v1399_v26 }
  0x38   : > { %232 = vst [vmem:[#allocation2 + $0xb8] sm:$0x3] %v1400_v27 }
  0x39   : > { %234 = vst [vmem:[#allocation2 + $0xd0] sm:$0x3] %v1401_v28 }
  0x3a   : > { %236 = vst [vmem:[#allocation2 + $0xe8] sm:$0x3] %v1402_v29 }
  0x3b   : > { %240 = vsyncadd [#allocation3], 2880 }
  0x3c PF: > { %s241_s28 = sadd.s32 1, %s1750_s15 }
  0x3d   : > { %p1403_p1 = scmp.ge.s32.totalorder %s241_s28, 2 }
  0x3e   : > { %s246_s29 = ssub.s32 (!%p1403_p1), 1, %s2896_s10  ;;  %s1319_s5 = smul.u32 (!%p1403_p1), 192, %s1750_s15 }
  0x3f   : > { %245 = sbr.rel (%p1403_p1) target bundleno = 100 (0x64), region = 58  ;;  %s254_s27 = scalar_lea.sflag (!%p1403_p1), [#allocation3], %s246_s29 }
  0x40   : > { %s1320_s6 = smul.u32 (!%p1403_p1), 432, %s1754_s16 }
  0x41   : > { %s252_s7 = smul.u32 (!%p1403_p1), 240, %s246_s29 }
  0x42   : > { %s1321_s8 = sadd.s32 (!%p1403_p1), %s1320_s6, %s1319_s5 }
  0x43   : > { %s1917_s21 = scalar_lea.vmem (!%p1403_p1), %s2874_s0, %s1321_s8  ;;  %s1922_s24 = scalar_lea.vmem (!%p1403_p1), [#allocation2], %s252_s7 }
  0x44   : > { %v1404_v30 = vld [vmem:[%s1917_s21 + $0xc0] sm:$0xff]  ;;  %v1405_v31 = vld [vmem:[%s1917_s21 + $0xc8] sm:$0xff]  ;;  %v1406_v32 = vld [vmem:[%s1917_s21 + $0xd8] sm:$0xff] }
  0x45   : > { %268 = vst [vmem:[%s1922_s24] sm:$0xff] %v1404_v30  ;;  %v1407_v33 = vld [vmem:[%s1917_s21 + $0xe0] sm:$0xff]  ;;  %v1408_v34 = vld [vmem:[%s1917_s21 + $0xf0] sm:$0xff]  ;;  %v1409_v35 = vld [vmem:[%s1917_s21 + $0xf8] sm:$0xff] }
  0x46   : > { %270 = vst [vmem:[%s1922_s24 + $0x8] sm:$0xff] %v1405_v31  ;;  %v1410_v36 = vld [vmem:[%s1917_s21 + $0x108] sm:$0xff]  ;;  %v1411_v37 = vld [vmem:[%s1917_s21 + $0x110] sm:$0xff]  ;;  %v1412_v38 = vld [vmem:[%s1917_s21 + $0x120] sm:$0xff] }
  0x47   : > { %272 = vst [vmem:[%s1922_s24 + $0x18] sm:$0xff] %v1406_v32  ;;  %v1413_v39 = vld [vmem:[%s1917_s21 + $0x128] sm:$0xff]  ;;  %v1414_v40 = vld [vmem:[%s1917_s21 + $0x138] sm:$0xff]  ;;  %v1415_v41 = vld [vmem:[%s1917_s21 + $0x140] sm:$0xff] }
  0x48   : > { %274 = vst [vmem:[%s1922_s24 + $0x20] sm:$0xff] %v1407_v33  ;;  %v1416_v42 = vld [vmem:[%s1917_s21 + $0x150] sm:$0xff]  ;;  %v1417_v43 = vld [vmem:[%s1917_s21 + $0x158] sm:$0xff]  ;;  %v1418_v44 = vld [vmem:[%s1917_s21 + $0x168] sm:$0xff] }
  0x49   : > { %276 = vst [vmem:[%s1922_s24 + $0x30] sm:$0xff] %v1408_v34  ;;  %v1419_v45 = vld [vmem:[%s1917_s21 + $0x170] sm:$0xff]  ;;  %v1420_v46 = vld [vmem:[%s1917_s21 + $0x180] sm:$0xff]  ;;  %v1421_v47 = vld [vmem:[%s1917_s21 + $0x188] sm:$0xff] }
  0x4a   : > { %278 = vst [vmem:[%s1922_s24 + $0x38] sm:$0xff] %v1409_v35  ;;  %v1422_v48 = vld [vmem:[%s1917_s21 + $0x198] sm:$0xff]  ;;  %v1423_v49 = vld [vmem:[%s1917_s21 + $0x1a0] sm:$0xff]  ;;  %v1424_v50 = vld [vmem:[%s1917_s21 + $0xd0] sm:$0x3] }
  0x4b   : > { %280 = vst [vmem:[%s1922_s24 + $0x48] sm:$0xff] %v1410_v36  ;;  %v1426_v51 = vld [vmem:[%s1917_s21 + $0xe8] sm:$0x3]  ;;  %v1428_v52 = vld [vmem:[%s1917_s21 + $0x100] sm:$0x3] }
  0x4c   : > { %282 = vst [vmem:[%s1922_s24 + $0x50] sm:$0xff] %v1411_v37  ;;  %v1430_v53 = vld [vmem:[%s1917_s21 + $0x118] sm:$0x3]  ;;  %v1432_v54 = vld [vmem:[%s1917_s21 + $0x130] sm:$0x3] }
  0x4d   : > { %284 = vst [vmem:[%s1922_s24 + $0x60] sm:$0xff] %v1412_v38  ;;  %v1434_v55 = vld [vmem:[%s1917_s21 + $0x148] sm:$0x3]  ;;  %v1436_v56 = vld [vmem:[%s1917_s21 + $0x160] sm:$0x3] }
  0x4e   : > { %286 = vst [vmem:[%s1922_s24 + $0x68] sm:$0xff] %v1413_v39  ;;  %v1438_v57 = vld [vmem:[%s1917_s21 + $0x178] sm:$0x3]  ;;  %v1440_v58 = vld [vmem:[%s1917_s21 + $0x190] sm:$0x3] }
  0x4f   : > { %288 = vst [vmem:[%s1922_s24 + $0x78] sm:$0xff] %v1414_v40  ;;  %v1442_v59 = vld [vmem:[%s1917_s21 + $0x1a8] sm:$0x3] }
  0x50   : > { %290 = vst [vmem:[%s1922_s24 + $0x80] sm:$0xff] %v1415_v41 }
  0x51   : > { %292 = vst [vmem:[%s1922_s24 + $0x90] sm:$0xff] %v1416_v42 }
  0x52   : > { %294 = vst [vmem:[%s1922_s24 + $0x98] sm:$0xff] %v1417_v43 }
  0x53   : > { %296 = vst [vmem:[%s1922_s24 + $0xa8] sm:$0xff] %v1418_v44 }
  0x54   : > { %298 = vst [vmem:[%s1922_s24 + $0xb0] sm:$0xff] %v1419_v45 }
  0x55   : > { %300 = vst [vmem:[%s1922_s24 + $0xc0] sm:$0xff] %v1420_v46 }
  0x56   : > { %302 = vst [vmem:[%s1922_s24 + $0xc8] sm:$0xff] %v1421_v47 }
  0x57   : > { %304 = vst [vmem:[%s1922_s24 + $0xd8] sm:$0xff] %v1422_v48 }
  0x58   : > { %306 = vst [vmem:[%s1922_s24 + $0xe0] sm:$0xff] %v1423_v49 }
  0x59   : > { %1425 = vst [vmem:[%s1922_s24 + $0x10] sm:$0x3] %v1424_v50 }
  0x5a   : > { %1427 = vst [vmem:[%s1922_s24 + $0x28] sm:$0x3] %v1426_v51 }
  0x5b   : > { %1429 = vst [vmem:[%s1922_s24 + $0x40] sm:$0x3] %v1428_v52 }
  0x5c   : > { %1431 = vst [vmem:[%s1922_s24 + $0x58] sm:$0x3] %v1430_v53 }
  0x5d   : > { %1433 = vst [vmem:[%s1922_s24 + $0x70] sm:$0x3] %v1432_v54 }
  0x5e   : > { %1435 = vst [vmem:[%s1922_s24 + $0x88] sm:$0x3] %v1434_v55 }
  0x5f   : > { %1437 = vst [vmem:[%s1922_s24 + $0xa0] sm:$0x3] %v1436_v56 }
  0x60   : > { %1439 = vst [vmem:[%s1922_s24 + $0xb8] sm:$0x3] %v1438_v57 }
  0x61   : > { %1441 = vst [vmem:[%s1922_s24 + $0xd0] sm:$0x3] %v1440_v58 }
  0x62   : > { %1443 = vst [vmem:[%s1922_s24 + $0xe8] sm:$0x3] %v1442_v59 }
  0x63   : > { %340 = vsyncadd %s254_s27, 2880 }
  0x64 PF: > { %s341_s28 = smul.u32 240, %s2896_s10  ;;  %s343_s6 = scalar_lea.sflag [#allocation3], %s2896_s10 }
  0x66   : > { %s1984_s5 = scalar_lea.vmem [#allocation2], %s341_s28 }
  0x67   : > { %1730 = dma.done.wait %s343_s6, 2880 }
  0x68   : > { %1731 = vsyncadd %s343_s6, 4294964416  ;;  %v509_v60 = vld [vmem:[%s2875_s1 + $0x78] sm:$0xff]  ;;  %v508_v61 = vld [vmem:[%s2875_s1 + $0x70] sm:$0xff]  ;;  %s1542_s29 = sshll.u32 %s1754_s16, 5  ;;  %s1274_s27 = sshll.u32 %s1869_s11, 4  ;;  %s1275_s27 = int_to_ptr.vmem [resolvable:$true] %s1274_s27 }
  0x69   : > { %1548 = vmatpush.msra.mxu1 %v509_v60  ;;  %1549 = vmatpush.msra.mxu2 %v509_v60  ;;  %v507_v62 = vld [vmem:[%s2875_s1 + $0x68] sm:$0xff]  ;;  %v506_v63 = vld [vmem:[%s2875_s1 + $0x60] sm:$0xff]  ;;  %v505_v0 = vld [vmem:[%s2875_s1 + $0x58] sm:$0xff]  ;;  %s1260_s6 = scalar_lea.sflag [#allocation5], %s134_s4 }
  0x6a   : > { %1550 = vmatpush.msra.mxu3 %v509_v60  ;;  %642 = vmatpush.msra.mxu0 %v509_v60  ;;  %v504_v1 = vld [vmem:[%s2875_s1 + $0x50] sm:$0xff]  ;;  %v503_v2 = vld [vmem:[%s2875_s1 + $0x48] sm:$0xff]  ;;  %v502_v3 = vld [vmem:[%s2875_s1 + $0x40] sm:$0xff] }
  0x6b   : > { %1551 = vmatpush.msra.mxu1 %v508_v61  ;;  %1552 = vmatpush.msra.mxu2 %v508_v61  ;;  %v501_v4 = vld [vmem:[%s2875_s1 + $0x38] sm:$0xff]  ;;  %v500_v5 = vld [vmem:[%s2875_s1 + $0x30] sm:$0xff]  ;;  %v499_v6 = vld [vmem:[%s2875_s1 + $0x28] sm:$0xff] }
  0x6c   : > { %1553 = vmatpush.msra.mxu3 %v508_v61  ;;  %643 = vmatpush.msra.mxu0 %v508_v61  ;;  %v498_v7 = vld [vmem:[%s2875_s1 + $0x20] sm:$0xff]  ;;  %v497_v8 = vld [vmem:[%s2875_s1 + $0x18] sm:$0xff]  ;;  %v496_v9 = vld [vmem:[%s2875_s1 + $0x10] sm:$0xff] }
  0x6d   : > { %1554 = vmatpush.msra.mxu1 %v507_v62  ;;  %1555 = vmatpush.msra.mxu2 %v507_v62  ;;  %v495_v10 = vld [vmem:[%s2875_s1 + $0x8] sm:$0xff]  ;;  %v494_v11 = vld [vmem:[%s2875_s1] sm:$0xff]  ;;  %v541_v14 = vld [vmem:[%s2875_s1 + $0x178] sm:$0xff] }
  0x6e   : > { %1556 = vmatpush.msra.mxu3 %v507_v62  ;;  %644 = vmatpush.msra.mxu0 %v507_v62  ;;  %v2036_v12 = vld [vmem:[%s1984_s5 + $0x30] sm:$0xff]  ;;  %v2039_v13 = vld [vmem:[%s1984_s5 + $0x60] sm:$0xff]  ;;  %v525_v15 = vld [vmem:[%s2875_s1 + $0xf8] sm:$0xff] }
  0x6f   : > { %1557 = vmatpush.msra.mxu1 %v506_v63  ;;  %1558 = vmatpush.msra.mxu2 %v506_v63  ;;  %v2048_v16 = vld [vmem:[%s1984_s5 + $0x90] sm:$0xff]  ;;  %v557_v18 = vld [vmem:[%s2875_s1 + $0x1f8] sm:$0xff]  ;;  %v539_v20 = vld [vmem:[%s2875_s1 + $0x168] sm:$0xff] }
  0x70   : > { %1559 = vmatpush.msra.mxu3 %v506_v63  ;;  %645 = vmatpush.msra.mxu0 %v506_v63  ;;  %v540_v17 = vld [vmem:[%s2875_s1 + $0x170] sm:$0xff]  ;;  %v523_v22 = vld [vmem:[%s2875_s1 + $0xe8] sm:$0xff]  ;;  %v538_v24 = vld [vmem:[%s2875_s1 + $0x160] sm:$0xff] }
  0x71   : > { %1560 = vmatpush.msra.mxu1 %v505_v0  ;;  %1561 = vmatpush.msra.mxu2 %v505_v0  ;;  %v524_v19 = vld [vmem:[%s2875_s1 + $0xf0] sm:$0xff]  ;;  %v555_v25 = vld [vmem:[%s2875_s1 + $0x1e8] sm:$0xff]  ;;  %v522_v26 = vld [vmem:[%s2875_s1 + $0xe0] sm:$0xff] }
  0x72   : > { %1562 = vmatpush.msra.mxu3 %v505_v0  ;;  %646 = vmatpush.msra.mxu0 %v505_v0  ;;  %v556_v21 = vld [vmem:[%s2875_s1 + $0x1f0] sm:$0xff]  ;;  %v2082_v27 = vld [vmem:[%s1984_s5 + $0x68] sm:$0xff]  ;;  %v2085_v28 = vld [vmem:[%s1984_s5 + $0x38] sm:$0xff] }
  0x73   : > { %1563 = vmatpush.msra.mxu1 %v504_v1  ;;  %1564 = vmatpush.msra.mxu2 %v504_v1  ;;  %v348_v23 = vld [vmem:[%s1984_s5] sm:$0xff]  ;;  %v537_v29 = vld [vmem:[%s2875_s1 + $0x158] sm:$0xff]  ;;  %v535_v37 = vld [vmem:[%s2875_s1 + $0x148] sm:$0xff] }
  0x74   : > { %1565 = vmatpush.msra.mxu3 %v504_v1  ;;  %647 = vmatpush.msra.mxu0 %v504_v1  ;;  %v554_v30 = vld [vmem:[%s2875_s1 + $0x1e0] sm:$0xff]  ;;  %v521_v31 = vld [vmem:[%s2875_s1 + $0xd8] sm:$0xff]  ;;  %v536_v33 = vld [vmem:[%s2875_s1 + $0x150] sm:$0xff] }
  0x75   : > { %1566 = vmatpush.msra.mxu1 %v503_v2  ;;  %1567 = vmatpush.msra.mxu2 %v503_v2  ;;  %v2098_v32 = vld [vmem:[%s1984_s5 + $0x98] sm:$0xff]  ;;  %v520_v36 = vld [vmem:[%s2875_s1 + $0xd0] sm:$0xff]  ;;  %v534_v41 = vld [vmem:[%s2875_s1 + $0x140] sm:$0xff] }
  0x76   : > { %1568 = vmatpush.msra.mxu3 %v503_v2  ;;  %648 = vmatpush.msra.mxu0 %v503_v2  ;;  %v553_v34 = vld [vmem:[%s2875_s1 + $0x1d8] sm:$0xff]  ;;  %v552_v38 = vld [vmem:[%s2875_s1 + $0x1d0] sm:$0xff]  ;;  %v519_v40 = vld [vmem:[%s2875_s1 + $0xc8] sm:$0xff] }
  0x77   : > { %1569 = vmatpush.msra.mxu1 %v502_v3  ;;  %1570 = vmatpush.msra.mxu2 %v502_v3  ;;  %v573_v35 = vld [vmem:[%s2875_s1 + $0x278] sm:$0xff]  ;;  %v572_v39 = vld [vmem:[%s2875_s1 + $0x270] sm:$0xff]  ;;  %v551_v42 = vld [vmem:[%s2875_s1 + $0x1c8] sm:$0xff] }
  0x78   : > { %1571 = vmatpush.msra.mxu3 %v502_v3  ;;  %649 = vmatpush.msra.mxu0 %v502_v3  ;;  %v571_v43 = vld [vmem:[%s2875_s1 + $0x268] sm:$0xff]  ;;  %v518_v44 = vld [vmem:[%s2875_s1 + $0xc0] sm:$0xff]  ;;  %v533_v47 = vld [vmem:[%s2875_s1 + $0x138] sm:$0xff] }
  0x79   : > { %1572 = vmatpush.msra.mxu1 %v501_v4  ;;  %1573 = vmatpush.msra.mxu2 %v501_v4  ;;  %v2139_v45 = vld [vmem:[%s1984_s5 + $0x78] sm:$0xff]  ;;  %v2142_v46 = vld [vmem:[%s1984_s5 + $0x48] sm:$0xff]  ;;  %v550_v48 = vld [vmem:[%s2875_s1 + $0x1c0] sm:$0xff] }
  0x7a   : > { %1574 = vmatpush.msra.mxu3 %v501_v4  ;;  %650 = vmatpush.msra.mxu0 %v501_v4  ;;  %v570_v49 = vld [vmem:[%s2875_s1 + $0x260] sm:$0xff]  ;;  %v517_v50 = vld [vmem:[%s2875_s1 + $0xb8] sm:$0xff]  ;;  %v532_v53 = vld [vmem:[%s2875_s1 + $0x130] sm:$0xff] }
  0x7b   : > { %1575 = vmatpush.msra.mxu1 %v500_v5  ;;  %1576 = vmatpush.msra.mxu2 %v500_v5  ;;  %v349_v51 = vld [vmem:[%s1984_s5 + $0x8] sm:$0xff]  ;;  %v516_v56 = vld [vmem:[%s2875_s1 + $0xb0] sm:$0xff]  ;;  %v530_v61 = vld [vmem:[%s2875_s1 + $0x120] sm:$0xff] }
  0x7c   : > { %1577 = vmatpush.msra.mxu3 %v500_v5  ;;  %651 = vmatpush.msra.mxu0 %v500_v5  ;;  %v2160_v52 = vld [vmem:[%s1984_s5 + $0xa8] sm:$0xff]  ;;  %v548_v58 = vld [vmem:[%s2875_s1 + $0x1b0] sm:$0xff]  ;;  %v514_v0 = vld [vmem:[%s2875_s1 + $0xa0] sm:$0xff] }
  0x7d   : > { %1578 = vmatpush.msra.mxu1 %v499_v6  ;;  %1579 = vmatpush.msra.mxu2 %v499_v6  ;;  %v549_v54 = vld [vmem:[%s2875_s1 + $0x1b8] sm:$0xff]  ;;  %v531_v57 = vld [vmem:[%s2875_s1 + $0x128] sm:$0xff]  ;;  %v568_v59 = vld [vmem:[%s2875_s1 + $0x250] sm:$0xff] }
  0x7e   : > { %1580 = vmatpush.msra.mxu3 %v499_v6  ;;  %652 = vmatpush.msra.mxu0 %v499_v6  ;;  %v569_v55 = vld [vmem:[%s2875_s1 + $0x258] sm:$0xff]  ;;  %v515_v60 = vld [vmem:[%s2875_s1 + $0xa8] sm:$0xff]  ;;  %v2200_v1 = vld [vmem:[%s1984_s5 + $0x80] sm:$0xff] }
  0x7f   : > { %1581 = vmatpush.msra.mxu1 %v498_v7  ;;  %1582 = vmatpush.msra.mxu2 %v498_v7  ;;  %v547_v62 = vld [vmem:[%s2875_s1 + $0x1a8] sm:$0xff]  ;;  %v2203_v2 = vld [vmem:[%s1984_s5 + $0x50] sm:$0xff]  ;;  %v529_v3 = vld [vmem:[%s2875_s1 + $0x118] sm:$0xff] }
  0x80   : > { %1583 = vmatpush.msra.mxu3 %v498_v7  ;;  %653 = vmatpush.msra.mxu0 %v498_v7  ;;  %v567_v63 = vld [vmem:[%s2875_s1 + $0x248] sm:$0xff]  ;;  %v546_v4 = vld [vmem:[%s2875_s1 + $0x1a0] sm:$0xff]  ;;  %v513_v6 = vld [vmem:[%s2875_s1 + $0x98] sm:$0xff] }
  0x81   : > { %1584 = vmatpush.msra.mxu1 %v497_v8  ;;  %1585 = vmatpush.msra.mxu2 %v497_v8  ;;  %v566_v5 = vld [vmem:[%s2875_s1 + $0x240] sm:$0xff]  ;;  %v350_v7 = vld [vmem:[%s1984_s5 + $0x18] sm:$0xff] }
  0x82   : > { %1586 = vmatpush.msra.mxu3 %v497_v8  ;;  %654 = vmatpush.msra.mxu0 %v497_v8  ;;  %v2221_v8 = vld [vmem:[%s1984_s5 + $0xb0] sm:$0xff] }
  0x83   : > { %1587 = vmatpush.msra.mxu1 %v496_v9  ;;  %1588 = vmatpush.msra.mxu2 %v496_v9 }
  0x84   : > { %1589 = vmatpush.msra.mxu3 %v496_v9  ;;  %655 = vmatpush.msra.mxu0 %v496_v9  ;;  %v528_v9 = vld [vmem:[%s2875_s1 + $0x110] sm:$0xff] }
  0x85   : > { %1590 = vmatpush.msra.mxu1 %v495_v10  ;;  %1591 = vmatpush.msra.mxu2 %v495_v10 }
  0x86   : > { %1592 = vmatpush.msra.mxu3 %v495_v10  ;;  %656 = vmatpush.msra.mxu0 %v495_v10  ;;  %v545_v10 = vld [vmem:[%s2875_s1 + $0x198] sm:$0xff] }
  0x87   : > { %1593 = vmatpush.msra.mxu1 %v494_v11  ;;  %1594 = vmatpush.msra.mxu2 %v494_v11 }
  0x88   : > { %670 = vmatmul.f32.vlgmr.msra.gmra.mxu1 %v2036_v12  ;;  %682 = vmatmul.f32.vlgmr.msra.gmra.mxu2 %v2039_v13 }
  0x89   : > { %772 = vmatpush.msrb.mxu2 %v541_v14  ;;  %1595 = vmatpush.msra.mxu3 %v494_v11  ;;  %v512_v14 = vld [vmem:[%s2875_s1 + $0x90] sm:$0xff] }
  0x8a   : > { %707 = vmatpush.msrb.mxu1 %v525_v15  ;;  %694 = vmatmul.f32.vlgmr.msra.gmra.mxu3 %v2048_v16  ;;  %v527_v15 = vld [vmem:[%s2875_s1 + $0x108] sm:$0xff] }
  0x8b   : > { %773 = vmatpush.msrb.mxu2 %v540_v17  ;;  %837 = vmatpush.msrb.mxu3 %v557_v18  ;;  %v544_v17 = vld [vmem:[%s2875_s1 + $0x190] sm:$0xff] }
  0x8c   : > { %708 = vmatpush.msrb.mxu1 %v524_v19  ;;  %657 = vmatpush.msra.mxu0 %v494_v11  ;;  %v565_v11 = vld [vmem:[%s2875_s1 + $0x238] sm:$0xff]  ;;  %v564_v18 = vld [vmem:[%s2875_s1 + $0x230] sm:$0xff]  ;;  %v511_v19 = vld [vmem:[%s2875_s1 + $0x88] sm:$0xff] }
  0x8d   : > { %774 = vmatpush.msrb.mxu2 %v539_v20  ;;  %838 = vmatpush.msrb.mxu3 %v556_v21  ;;  %v526_v20 = vld [vmem:[%s2875_s1 + $0x100] sm:$0xff]  ;;  %v543_v21 = vld [vmem:[%s2875_s1 + $0x188] sm:$0xff] }
  0x8e   : > { %709 = vmatpush.msrb.mxu1 %v523_v22  ;;  %658 = vmatmul.f32.vlgmr.msra.gmra.mxu0 %v348_v23  ;;  %v563_v22 = vld [vmem:[%s2875_s1 + $0x228] sm:$0xff]  ;;  %v510_v23 = vld [vmem:[%s2875_s1 + $0x80] sm:$0xff] }
  0x8f   : > { %775 = vmatpush.msrb.mxu2 %v538_v24  ;;  %839 = vmatpush.msrb.mxu3 %v555_v25  ;;  %v380_v24 = vld [vmem:[%s1984_s5 + $0x2] sm:$0xff] }
  0x90   : > { %710 = vmatpush.msrb.mxu1 %v522_v26  ;;  %685 = vmatmul.f32.gmra.mxu2 %v2082_v27  ;;  %v364_v25 = vld [vmem:[%s1984_s5 + $0x1] sm:$0xff] }
  0x91   : > { %673 = vmatmul.f32.gmra.mxu1 %v2085_v28  ;;  %776 = vmatpush.msrb.mxu2 %v537_v29  ;;  %v542_v26 = vld [vmem:[%s2875_s1 + $0x180] sm:$0xff] }
  0x92   : > { %840 = vmatpush.msrb.mxu3 %v554_v30  ;;  %711 = vmatpush.msrb.mxu1 %v521_v31  ;;  %v562_v29 = vld [vmem:[%s2875_s1 + $0x220] sm:$0xff]  ;;  %v605_v30 = vld [vmem:[%s2875_s1 + $0x378] sm:$0xff] }
  0x93   : > { %697 = vmatmul.f32.gmra.mxu3 %v2098_v32  ;;  %777 = vmatpush.msrb.mxu2 %v536_v33  ;;  %v351_v31 = vld [vmem:[%s1984_s5 + $0x20] sm:$0xff]  ;;  %v561_v33 = vld [vmem:[%s2875_s1 + $0x218] sm:$0xff] }
  0x94   : > { %841 = vmatpush.msrb.mxu3 %v553_v34  ;;  %902 = vmatpush.msrb.mxu0 %v573_v35  ;;  %v621_v34 = vld [vmem:[%s2875_s1 + $0x3f8] sm:$0xff] }
  0x95   : > { %712 = vmatpush.msrb.mxu1 %v520_v36  ;;  %778 = vmatpush.msrb.mxu2 %v535_v37  ;;  %v589_v35 = vld [vmem:[%s2875_s1 + $0x2f8] sm:$0xff]  ;;  %v604_v36 = vld [vmem:[%s2875_s1 + $0x370] sm:$0xff] }
  0x96   : > { %842 = vmatpush.msrb.mxu3 %v552_v38  ;;  %903 = vmatpush.msrb.mxu0 %v572_v39  ;;  %v560_v37 = vld [vmem:[%s2875_s1 + $0x210] sm:$0xff] }
  0x97   : > { %713 = vmatpush.msrb.mxu1 %v519_v40  ;;  %779 = vmatpush.msrb.mxu2 %v534_v41  ;;  %v620_v38 = vld [vmem:[%s2875_s1 + $0x3f0] sm:$0xff]  ;;  %v603_v40 = vld [vmem:[%s2875_s1 + $0x368] sm:$0xff] }
  0x98   : > { %843 = vmatpush.msrb.mxu3 %v551_v42  ;;  %904 = vmatpush.msrb.mxu0 %v571_v43  ;;  %v588_v39 = vld [vmem:[%s2875_s1 + $0x2f0] sm:$0xff]  ;;  %v559_v41 = vld [vmem:[%s2875_s1 + $0x208] sm:$0xff] }
  0x99   : > { %714 = vmatpush.msrb.mxu1 %v518_v44  ;;  %688 = vmatmul.f32.gmra.mxu2 %v2139_v45  ;;  %v381_v42 = vld [vmem:[%s1984_s5 + $0xa] sm:$0xff] }
  0x9a   : > { %676 = vmatmul.f32.gmra.mxu1 %v2142_v46  ;;  %780 = vmatpush.msrb.mxu2 %v533_v47  ;;  %v365_v43 = vld [vmem:[%s1984_s5 + $0x9] sm:$0xff] }
  0x9b   : > { %844 = vmatpush.msrb.mxu3 %v550_v48  ;;  %905 = vmatpush.msrb.mxu0 %v570_v49  ;;  %v619_v44 = vld [vmem:[%s2875_s1 + $0x3e8] sm:$0xff]  ;;  %v558_v47 = vld [vmem:[%s2875_s1 + $0x200] sm:$0xff] }
  0x9c   : > { %715 = vmatpush.msrb.mxu1 %v517_v50  ;;  %661 = vmatmul.f32.gmra.mxu0 %v349_v51  ;;  %v587_v48 = vld [vmem:[%s2875_s1 + $0x2e8] sm:$0xff]  ;;  %v637_v50 = vld [vmem:[%s2875_s1 + $0x478] sm:$0xff]  ;;  %v602_v51 = vld [vmem:[%s2875_s1 + $0x360] sm:$0xff] }
  0x9d   : > { %700 = vmatmul.f32.gmra.mxu3 %v2160_v52  ;;  %781 = vmatpush.msrb.mxu2 %v532_v53  ;;  %v1460_v49 = vld [vmem:[%s1984_s5 + $0x19] sm:$0xff] }
  0x9e   : > { %845 = vmatpush.msrb.mxu3 %v549_v54  ;;  %906 = vmatpush.msrb.mxu0 %v569_v55  ;;  %v618_v53 = vld [vmem:[%s2875_s1 + $0x3e0] sm:$0xff]  ;;  %v636_v55 = vld [vmem:[%s2875_s1 + $0x470] sm:$0xff] }
  0x9f   : > { %716 = vmatpush.msrb.mxu1 %v516_v56  ;;  %782 = vmatpush.msrb.mxu2 %v531_v57  ;;  %v586_v54 = vld [vmem:[%s2875_s1 + $0x2e0] sm:$0xff]  ;;  %v601_v56 = vld [vmem:[%s2875_s1 + $0x358] sm:$0xff] }
  0xa0   : > { %846 = vmatpush.msrb.mxu3 %v548_v58  ;;  %907 = vmatpush.msrb.mxu0 %v568_v59  ;;  %v617_v57 = vld [vmem:[%s2875_s1 + $0x3d8] sm:$0xff] }
  0xa1   : > { %717 = vmatpush.msrb.mxu1 %v515_v60  ;;  %783 = vmatpush.msrb.mxu2 %v530_v61  ;;  %v585_v58 = vld [vmem:[%s2875_s1 + $0x2d8] sm:$0xff]  ;;  %v635_v60 = vld [vmem:[%s2875_s1 + $0x468] sm:$0xff]  ;;  %v600_v61 = vld [vmem:[%s2875_s1 + $0x350] sm:$0xff] }
  0xa2   : > { %847 = vmatpush.msrb.mxu3 %v547_v62  ;;  %908 = vmatpush.msrb.mxu0 %v567_v63  ;;  %v2336_v59 = vld [vmem:[%s1984_s5 + $0x1a] sm:$0xff] }
  0xa3   : > { %718 = vmatpush.msrb.mxu1 %v514_v0  ;;  %691 = vmatmul.f32.gmra.mxu2 %v2200_v1  ;;  %v634_v62 = vld [vmem:[%s2875_s1 + $0x460] sm:$0xff]  ;;  %v616_v63 = vld [vmem:[%s2875_s1 + $0x3d0] sm:$0xff] }
  0xa4   : > { %679 = vmatmul.f32.gmra.mxu1 %v2203_v2  ;;  %784 = vmatpush.msrb.mxu2 %v529_v3  ;;  %v1461_v0 = vld [vmem:[%s1984_s5 + $0x21] sm:$0xff] }
  0xa5   : > { %848 = vmatpush.msrb.mxu3 %v546_v4  ;;  %909 = vmatpush.msrb.mxu0 %v566_v5  ;;  %v633_v3 = vld [vmem:[%s2875_s1 + $0x458] sm:$0xff]  ;;  %v584_v4 = vld [vmem:[%s2875_s1 + $0x2d0] sm:$0xff]  ;;  %v599_v5 = vld [vmem:[%s2875_s1 + $0x348] sm:$0xff] }
  0xa6   : > { %719 = vmatpush.msrb.mxu1 %v513_v6  ;;  %664 = vmatmul.f32.gmra.mxu0 %v350_v7  ;;  %v615_v6 = vld [vmem:[%s2875_s1 + $0x3c8] sm:$0xff] }
  0xa7   : > { %703 = vmatmul.f32.gmra.mxu3 %v2221_v8  ;;  %785 = vmatpush.msrb.mxu2 %v528_v9  ;;  %v583_v9 = vld [vmem:[%s2875_s1 + $0x2c8] sm:$0xff] }
  0xa8   : > { %849 = vmatpush.msrb.mxu3 %v545_v10  ;;  %910 = vmatpush.msrb.mxu0 %v565_v11  ;;  %v2372_v10 = vld [vmem:[%s1984_s5 + $0x22] sm:$0xff]  ;;  %v2376_v11 = vld [vmem:[%s1984_s5 + $0x31] sm:$0xff] }
  0xa9   : > { %720 = vmatpush.msrb.mxu1 %v512_v14  ;;  %786 = vmatpush.msrb.mxu2 %v527_v15  ;;  %v598_v14 = vld [vmem:[%s2875_s1 + $0x340] sm:$0xff] }
  0xaa   : > { %850 = vmatpush.msrb.mxu3 %v544_v17  ;;  %911 = vmatpush.msrb.mxu0 %v564_v18  ;;  %v614_v15 = vld [vmem:[%s2875_s1 + $0x3c0] sm:$0xff]  ;;  %v631_v17 = vld [vmem:[%s2875_s1 + $0x448] sm:$0xff] }
  0xab   : > { %721 = vmatpush.msrb.mxu1 %v511_v19  ;;  %787 = vmatpush.msrb.mxu2 %v526_v20  ;;  %v582_v18 = vld [vmem:[%s2875_s1 + $0x2c0] sm:$0xff] }
  0xac   : > { %851 = vmatpush.msrb.mxu3 %v543_v21  ;;  %912 = vmatpush.msrb.mxu0 %v563_v22  ;;  %v2393_v19 = vld [vmem:[%s1984_s5 + $0x32] sm:$0xff] }
  0xad   : > { %722 = vmatpush.msrb.mxu1 %v510_v23  ;;  %788 = vmatmul.f32.vlgmr.msrb.gmra.mxu2 %v380_v24  ;;  %v2397_v20 = vld [vmem:[%s1984_s5 + $0x39] sm:$0xff] }
  0xae   : > { %723 = vmatmul.f32.vlgmr.msrb.gmra.mxu1 %v364_v25  ;;  %852 = vmatpush.msrb.mxu3 %v542_v26  ;;  %v597_v21 = vld [vmem:[%s2875_s1 + $0x338] sm:$0xff]  ;;  %v630_v23 = vld [vmem:[%s2875_s1 + $0x440] sm:$0xff] }
  0xaf   : > { %913 = vmatpush.msrb.mxu0 %v562_v29  ;;  %1032 = vmatpush.msra.mxu2 %v605_v30  ;;  %v613_v22 = vld [vmem:[%s2875_s1 + $0x3b8] sm:$0xff]  ;;  %v596_v29 = vld [vmem:[%s2875_s1 + $0x330] sm:$0xff] }
  0xb0   : > { %667 = vmatmul.f32.gmra.mxu0 %v351_v31  ;;  %853 = vmatmul.f32.vlgmr.msrb.gmra.mxu3 %v350_v7  ;;  %v632_v7 = vld [vmem:[%s2875_s1 + $0x450] sm:$0xff]  ;;  %v581_v24 = vld [vmem:[%s2875_s1 + $0x2b8] sm:$0xff] }
  0xb1   : > { %914 = vmatpush.msrb.mxu0 %v561_v33  ;;  %1097 = vmatpush.msra.mxu3 %v621_v34  ;;  %v2415_v25 = vld [vmem:[%s1984_s5 + $0x3a] sm:$0xff]  ;;  %v2419_v26 = vld [vmem:[%s1984_s5 + $0x49] sm:$0xff] }
  0xb2   : > { %967 = vmatpush.msra.mxu1 %v589_v35  ;;  %1033 = vmatpush.msra.mxu2 %v604_v36  ;;  %v612_v30 = vld [vmem:[%s2875_s1 + $0x3b0] sm:$0xff]  ;;  %v595_v36 = vld [vmem:[%s2875_s1 + $0x328] sm:$0xff] }
  0xb3   : > { %915 = vmatpush.msrb.mxu0 %v560_v37  ;;  %1098 = vmatpush.msra.mxu3 %v620_v38  ;;  %v580_v33 = vld [vmem:[%s2875_s1 + $0x2b0] sm:$0xff]  ;;  %v611_v37 = vld [vmem:[%s2875_s1 + $0x3a8] sm:$0xff] }
  0xb4   : > { %968 = vmatpush.msra.mxu1 %v588_v39  ;;  %1034 = vmatpush.msra.mxu2 %v603_v40  ;;  %v2437_v34 = vld [vmem:[%s1984_s5 + $0x4a] sm:$0xff]  ;;  %v2459_v40 = vld [vmem:[%s1984_s5 + $0x52] sm:$0xff] }
  0xb5   : > { %916 = vmatpush.msrb.mxu0 %v559_v41  ;;  %791 = vmatmul.f32.gmra.mxu2 %v381_v42  ;;  %v2441_v35 = vld [vmem:[%s1984_s5 + $0x51] sm:$0xff] }
  0xb6   : > { %726 = vmatmul.f32.gmra.mxu1 %v365_v43  ;;  %1099 = vmatpush.msra.mxu3 %v619_v44  ;;  %v628_v38 = vld [vmem:[%s2875_s1 + $0x430] sm:$0xff]  ;;  %v579_v39 = vld [vmem:[%s2875_s1 + $0x2a8] sm:$0xff]  ;;  %v594_v41 = vld [vmem:[%s2875_s1 + $0x320] sm:$0xff] }
  0xb7   : > { %917 = vmatpush.msrb.mxu0 %v558_v47  ;;  %969 = vmatpush.msra.mxu1 %v587_v48  ;;  %v610_v42 = vld [vmem:[%s2875_s1 + $0x3a0] sm:$0xff]  ;;  %v627_v43 = vld [vmem:[%s2875_s1 + $0x428] sm:$0xff] }
  0xb8   : > { %856 = vmatmul.f32.gmra.mxu3 %v351_v31  ;;  %918 = vmatmul.f32.vlgmr.msrb.gmra.mxu0 %v1460_v49  ;;  %v629_v31 = vld [vmem:[%s2875_s1 + $0x438] sm:$0xff]  ;;  %v578_v44 = vld [vmem:[%s2875_s1 + $0x2a0] sm:$0xff] }
  0xb9   : > { %1162 = vmatpush.msra.mxu0 %v637_v50  ;;  %1035 = vmatpush.msra.mxu2 %v602_v51  ;;  %v2481_v47 = vld [vmem:[%s1984_s5 + $0x62] sm:$0xff] }
  0xba   : > { %1100 = vmatpush.msra.mxu3 %v618_v53  ;;  %970 = vmatpush.msra.mxu1 %v586_v54  ;;  %v2485_v48 = vld [vmem:[%s1984_s5 + $0x69] sm:$0xff] }
  0xbb   : > { %1163 = vmatpush.msra.mxu0 %v636_v55  ;;  %1036 = vmatpush.msra.mxu2 %v601_v56  ;;  %v609_v50 = vld [vmem:[%s2875_s1 + $0x398] sm:$0xff]  ;;  %v626_v51 = vld [vmem:[%s2875_s1 + $0x420] sm:$0xff]  ;;  %v592_v56 = vld [vmem:[%s2875_s1 + $0x310] sm:$0xff] }
  0xbc   : > { %1101 = vmatpush.msra.mxu3 %v617_v57  ;;  %971 = vmatpush.msra.mxu1 %v585_v58  ;;  %v577_v53 = vld [vmem:[%s2875_s1 + $0x298] sm:$0xff]  ;;  %v608_v57 = vld [vmem:[%s2875_s1 + $0x390] sm:$0xff] }
  0xbd   : > { %794 = vmatmul.f32.gmra.mxu2 %v2336_v59  ;;  %1164 = vmatpush.msra.mxu0 %v635_v60  ;;  %v2503_v54 = vld [vmem:[%s1984_s5 + $0x6a] sm:$0xff]  ;;  %v2507_v55 = vld [vmem:[%s1984_s5 + $0x79] sm:$0xff] }
  0xbe   : > { %729 = vmatmul.f32.gmra.mxu1 %v1460_v49  ;;  %1037 = vmatpush.msra.mxu2 %v600_v61  ;;  %v593_v49 = vld [vmem:[%s2875_s1 + $0x318] sm:$0xff]  ;;  %v576_v60 = vld [vmem:[%s2875_s1 + $0x290] sm:$0xff] }
  0xbf   : > { %1165 = vmatpush.msra.mxu0 %v634_v62  ;;  %1102 = vmatpush.msra.mxu3 %v616_v63  ;;  %v625_v58 = vld [vmem:[%s2875_s1 + $0x418] sm:$0xff]  ;;  %v591_v63 = vld [vmem:[%s2875_s1 + $0x308] sm:$0xff] }
  0xc0   : > { %859 = vmatmul.f32.gmra.mxu3 %v2036_v12  ;;  %921 = vmatmul.f32.gmra.mxu0 %v1461_v0  ;;  %v2525_v61 = vld [vmem:[%s1984_s5 + $0x7a] sm:$0xff] }
  0xc1   : > { %1166 = vmatpush.msra.mxu0 %v633_v3  ;;  %972 = vmatpush.msra.mxu1 %v584_v4  ;;  %v2529_v62 = vld [vmem:[%s1984_s5 + $0x81] sm:$0xff] }
  0xc2   : > { %1038 = vmatpush.msra.mxu2 %v599_v5  ;;  %1103 = vmatpush.msra.mxu3 %v615_v6  ;;  %v624_v3 = vld [vmem:[%s2875_s1 + $0x410] sm:$0xff]  ;;  %v575_v4 = vld [vmem:[%s2875_s1 + $0x288] sm:$0xff] }
  0xc3   : > { %1167 = vmatpush.msra.mxu0 %v632_v7  ;;  %973 = vmatpush.msra.mxu1 %v583_v9  ;;  %v2547_v5 = vld [vmem:[%s1984_s5 + $0x82] sm:$0xff] }
  0xc4   : > { %1039 = vmatpush.msra.mxu2 %v598_v14  ;;  %1104 = vmatpush.msra.mxu3 %v614_v15  ;;  %v590_v7 = vld [vmem:[%s2875_s1 + $0x300] sm:$0xff]  ;;  %v623_v14 = vld [vmem:[%s2875_s1 + $0x408] sm:$0xff] }
  0xc5   : > { %797 = vmatmul.f32.gmra.mxu2 %v2372_v10  ;;  %1168 = vmatpush.msra.mxu0 %v631_v17  ;;  %v606_v9 = vld [vmem:[%s2875_s1 + $0x380] sm:$0xff] }
  0xc6   : > { %732 = vmatmul.f32.gmra.mxu1 %v1461_v0  ;;  %1040 = vmatpush.msra.mxu2 %v597_v21  ;;  %v607_v0 = vld [vmem:[%s2875_s1 + $0x388] sm:$0xff]  ;;  %v574_v15 = vld [vmem:[%s2875_s1 + $0x280] sm:$0xff] }
  0xc7   : > { %974 = vmatpush.msra.mxu1 %v582_v18  ;;  %1105 = vmatpush.msra.mxu3 %v613_v22  ;;  %v2571_v17 = vld [vmem:[%s1984_s5 + $0x92] sm:$0xff] }
  0xc8   : > { %862 = vmatmul.f32.gmra.mxu3 %v2085_v28  ;;  %924 = vmatmul.f32.gmra.mxu0 %v2376_v11  ;;  %v2577_v18 = vld [vmem:[%s1984_s5 + $0x99] sm:$0xff] }
  0xc9   : > { %1169 = vmatpush.msra.mxu0 %v630_v23  ;;  %975 = vmatpush.msra.mxu1 %v581_v24  ;;  %v622_v24 = vld [vmem:[%s2875_s1 + $0x400] sm:$0xff] }
  0xca   : > { %1041 = vmatpush.msra.mxu2 %v596_v29  ;;  %1106 = vmatpush.msra.mxu3 %v612_v30  ;;  %v2590_v29 = vld [vmem:[%s1984_s5 + $0x9a] sm:$0xff] }
  0xcb   : > { %1170 = vmatpush.msra.mxu0 %v629_v31  ;;  %976 = vmatpush.msra.mxu1 %v580_v33  ;;  %v2596_v31 = vld [vmem:[%s1984_s5 + $0xa9] sm:$0xff] }
  0xcc   : > { %1042 = vmatpush.msra.mxu2 %v595_v36  ;;  %1107 = vmatpush.msra.mxu3 %v611_v37  ;;  %v2606_v37 = vld [vmem:[%s1984_s5 + $0xaa] sm:$0xff] }
  0xcd   : > { %800 = vmatmul.f32.gmra.mxu2 %v2393_v19  ;;  %1171 = vmatpush.msra.mxu0 %v628_v38  ;;  %v2611_v38 = vld [vmem:[%s2876_s2] ss:$0 sm:$0xff] }
  0xce   : > { %735 = vmatmul.f32.gmra.mxu1 %v2376_v11  ;;  %1043 = vmatpush.msra.mxu2 %v594_v41  ;;  %v2615_v41 = vld [vmem:[%s1984_s5 + $0xc0] sm:$0xff] }
  0xcf   : > { %977 = vmatpush.msra.mxu1 %v579_v39  ;;  %1108 = vmatpush.msra.mxu3 %v610_v42  ;;  %v2618_v42 = vld [vmem:[%s1984_s5 + $0xb1] sm:$0xff] }
  0xd0   : > { %865 = vmatmul.f32.gmra.mxu3 %v2142_v46  ;;  %927 = vmatmul.f32.gmra.mxu0 %v2397_v20 }
  0xd1   : > { %1172 = vmatpush.msra.mxu0 %v627_v43  ;;  %978 = vmatpush.msra.mxu1 %v578_v44 }
  0xd2   : > { %1044 = vmatpush.msra.mxu2 %v593_v49  ;;  %1109 = vmatpush.msra.mxu3 %v609_v50 }
  0xd3   : > { %1173 = vmatpush.msra.mxu0 %v626_v51  ;;  %979 = vmatpush.msra.mxu1 %v577_v53  ;;  %v2632_v51 = vld [vmem:[%s1984_s5 + $0xb2] sm:$0xff] }
  0xd4   : > { %1045 = vmatpush.msra.mxu2 %v592_v56  ;;  %1110 = vmatpush.msra.mxu3 %v608_v57  ;;  %v2636_v56 = vld [vmem:[%s1984_s5 + $0xc8] sm:$0xff] }
  0xd5   : > { %803 = vmatmul.f32.gmra.mxu2 %v2415_v25  ;;  %1174 = vmatpush.msra.mxu0 %v625_v58  ;;  %v2639_v57 = vld [vmem:[%s1984_s5 + $0xc1] sm:$0xff] }
  0xd6   : > { %738 = vmatmul.f32.gmra.mxu1 %v2397_v20  ;;  %1046 = vmatpush.msra.mxu2 %v591_v63 }
  0xd7   : > { %980 = vmatpush.msra.mxu1 %v576_v60  ;;  %1111 = vmatpush.msra.mxu3 %v607_v0 }
  0xd8   : > { %868 = vmatmul.f32.gmra.mxu3 %v2203_v2  ;;  %930 = vmatmul.f32.gmra.mxu0 %v2419_v26 }
  0xd9   : > { %1175 = vmatpush.msra.mxu0 %v624_v3  ;;  %981 = vmatpush.msra.mxu1 %v575_v4 }
  0xda   : > { %1047 = vmatpush.msra.mxu2 %v590_v7  ;;  %1112 = vmatpush.msra.mxu3 %v606_v9  ;;  %v2653_v9 = vld [vmem:[%s1984_s5 + $0xc9] sm:$0xff] }
  0xdb   : > { %1176 = vmatpush.msra.mxu0 %v623_v14  ;;  %982 = vmatpush.msra.mxu1 %v574_v15 }
  0xdd   : > { %806 = vmatmul.f32.gmra.mxu2 %v2437_v34  ;;  %1177 = vmatpush.msra.mxu0 %v622_v24 }
  0xde   : > { %741 = vmatmul.f32.gmra.mxu1 %v2419_v26 }
  0xe0   : > { %871 = vmatmul.f32.gmra.mxu3 %v2039_v13  ;;  %933 = vmatmul.f32.gmra.mxu0 %v2441_v35  ;;  %v2463_v13 = vld [vmem:[%s1984_s5 + $0x61] sm:$0xff] }
  0xe5   : > { %809 = vmatmul.f32.gmra.mxu2 %v2459_v40 }
  0xe6   : > { %744 = vmatmul.f32.gmra.mxu1 %v2441_v35 }
  0xe8   : > { %874 = vmatmul.f32.gmra.mxu3 %v2082_v27  ;;  %936 = vmatmul.f32.gmra.mxu0 %v2463_v13 }
  0xed   : > { %812 = vmatmul.f32.gmra.mxu2 %v2481_v47 }
  0xee   : > { %747 = vmatmul.f32.gmra.mxu1 %v2463_v13 }
  0xf0   : > { %877 = vmatmul.f32.gmra.mxu3 %v2139_v45  ;;  %939 = vmatmul.f32.gmra.mxu0 %v2485_v48 }
  0xf5   : > { %815 = vmatmul.f32.gmra.mxu2 %v2503_v54 }
  0xf6   : > { %750 = vmatmul.f32.gmra.mxu1 %v2485_v48 }
  0xf8   : > { %880 = vmatmul.f32.gmra.mxu3 %v2200_v1  ;;  %942 = vmatmul.f32.gmra.mxu0 %v2507_v55 }
  0xfd   : > { %818 = vmatmul.f32.gmra.mxu2 %v2525_v61 }
  0xfe   : > { %753 = vmatmul.f32.gmra.mxu1 %v2507_v55 }
 0x100   : > { %883 = vmatmul.f32.gmra.mxu3 %v2048_v16  ;;  %945 = vmatmul.f32.gmra.mxu0 %v2529_v62  ;;  %v2551_v16 = vld [vmem:[%s1984_s5 + $0x91] sm:$0xff] }
 0x105   : > { %821 = vmatmul.f32.gmra.mxu2 %v2547_v5  ;;  %v2553_v6 = vpop.f32.mrf.mxu1 }
 0x106   : > { %756 = vmatmul.f32.gmra.mxu1 %v2529_v62 }
 0x108   : > { %886 = vmatmul.f32.gmra.mxu3 %v2098_v32  ;;  %948 = vmatmul.f32.gmra.mxu0 %v2551_v16 }
 0x10b   : > { %v2573_v32 = vpop.f32.mrf.mxu2  ;;  %v659_v23 = vpop.f32.mrf.mxu0 }
 0x10c   : > { %v660_v4 = vadd.f32 %v2611_v38, %v659_v23 }
 0x10d   : > { %824 = vmatmul.f32.gmra.mxu2 %v2571_v17  ;;  %v2579_v21 = vpop.f32.mrf.mxu3 }
 0x10e   : > { %759 = vmatmul.f32.gmra.mxu1 %v2551_v16  ;;  %v2582_v22 = vpop.f32.mrf.mxu1 }
 0x110   : > { %889 = vmatmul.f32.gmra.mxu3 %v2160_v52  ;;  %951 = vmatmul.f32.gmra.mxu0 %v2577_v18 }
 0x113   : > { %v2592_v30 = vpop.f32.mrf.mxu2 }
 0x115   : > { %827 = vmatmul.f32.gmra.mxu2 %v2590_v29 }
 0x116   : > { %762 = vmatmul.f32.gmra.mxu1 %v2577_v18  ;;  %v2599_v52 = vpop.f32.mrf.mxu3 }
 0x117   : > { %v2601_v33 = vpop.f32.mrf.mxu1 }
 0x118   : > { %892 = vmatmul.f32.gmra.mxu3 %v2221_v8  ;;  %954 = vmatmul.f32.gmra.mxu0 %v2596_v31 }
 0x119   : > { %v662_v36 = vpop.f32.mrf.mxu0 }
 0x11a   : > { %v663_v23 = vadd.f32 %v2611_v38, %v662_v36 }
 0x11c   : > { %v689_v39 = vpop.f32.mrf.mxu2 }
 0x11d   : > { %830 = vmatmul.f32.gmra.mxu2 %v2606_v37  ;;  %v2621_v43 = vadd.f32 %v2611_v38, %v689_v39 }
 0x11e   : > { %765 = vmatmul.f32.gmra.mxu1 %v2596_v31 }
 0x120   : > { %895 = vmatmul.f32.gmra.mxu3 %v2615_v41  ;;  %957 = vmatmul.f32.gmra.mxu0 %v2618_v42  ;;  %v701_v44 = vpop.f32.mrf.mxu3 }
 0x121   : > { %v2626_v49 = vpop.f32.mrf.mxu1  ;;  %v2629_v50 = vadd.f32 %v2611_v38, %v701_v44 }
 0x123   : > { %v665_v53 = vpop.f32.mrf.mxu0 }
 0x125   : > { %833 = vmatmul.f32.gmra.mxu2 %v2632_v51 }
 0x126   : > { %768 = vmatmul.f32.gmra.mxu1 %v2618_v42  ;;  %v692_v58 = vpop.f32.mrf.mxu2 }
 0x127   : > { %v2643_v60 = vadd.f32 %v2611_v38, %v692_v58 }
 0x128   : > { %898 = vmatmul.f32.gmra.mxu3 %v2636_v56  ;;  %960 = vmatmul.f32.gmra.mxu0 %v2639_v57 }
 0x12a   : > { %v704_v63 = vpop.f32.mrf.mxu3 }
 0x12b   : > { %v2648_v0 = vadd.f32 %v2611_v38, %v704_v63  ;;  %v724_v3 = vpop.f32.mrf.mxu1 }
 0x12c   : > { %v725_v14 = vadd.f32 %v724_v3, %v660_v4 }
 0x12d   : > { %v668_v7 = vpop.f32.mrf.mxu0  ;;  %1048 = vmatmul.f32.vlgmr.msra.gmra.mxu2 %v2036_v12 }
 0x12e   : > { %983 = vmatmul.f32.vlgmr.msra.gmra.mxu1 %v2336_v59 }
 0x130   : > { %963 = vmatmul.f32.gmra.mxu0 %v2653_v9  ;;  %1113 = vmatmul.f32.vlgmr.msra.gmra.mxu3 %v2376_v11  ;;  %v789_v15 = vpop.f32.mrf.mxu2 }
 0x131   : > { %v790_v24 = vadd.f32 %v789_v15, %v725_v14  ;;  %v666_v15 = vadd.f32 %v2611_v38, %v665_v53  ;;  %v669_v53 = vadd.f32 %v2611_v38, %v668_v7  ;;  %v672_v7 = vadd.f32 %v2611_v38, %v2553_v6 }
 0x133   : > { %v727_v39 = vpop.f32.mrf.mxu1  ;;  %v854_v44 = vpop.f32.mrf.mxu3 }
 0x134   : > { %v2658_v58 = vadd.f32 %v854_v44, %v790_v24  ;;  %v728_v12 = vadd.f32 %v727_v39, %v663_v23 }
 0x135   : > { %v2661_v63 = vpop.f32.mrf.mxu0  ;;  %1051 = vmatmul.f32.gmra.mxu2 %v2085_v28 }
 0x136   : > { %986 = vmatmul.f32.gmra.mxu1 %v2372_v10 }
 0x138   : > { %1116 = vmatmul.f32.gmra.mxu3 %v2397_v20  ;;  %1178 = vmatmul.f32.vlgmr.msra.gmra.mxu0 %v2393_v19  ;;  %v792_v59 = vpop.f32.mrf.mxu2 }
 0x139   : > { %v793_v11 = vadd.f32 %v792_v59, %v728_v12  ;;  %v1496_v12 = vld [vmem:[%s1984_s5 + $0x60] sm:$0xff] }
 0x13b   : > { %v730_v3 = vpop.f32.mrf.mxu1  ;;  %v857_v4 = vpop.f32.mrf.mxu3 }
 0x13c   : > { %v2667_v14 = vadd.f32 %v857_v4, %v793_v11  ;;  %v731_v28 = vadd.f32 %v730_v3, %v666_v15 }
 0x13d   : > { %v2670_v36 = vpop.f32.mrf.mxu0  ;;  %1054 = vmatmul.f32.gmra.mxu2 %v2142_v46 }
 0x13e   : > { %989 = vmatmul.f32.gmra.mxu1 %v2393_v19 }
 0x140   : > { %1119 = vmatmul.f32.gmra.mxu3 %v2419_v26  ;;  %1181 = vmatmul.f32.gmra.mxu0 %v2415_v25  ;;  %v795_v10 = vpop.f32.mrf.mxu2 }
 0x141   : > { %v796_v20 = vadd.f32 %v795_v10, %v731_v28 }
 0x143   : > { %v733_v24 = vpop.f32.mrf.mxu1  ;;  %v860_v39 = vpop.f32.mrf.mxu3 }
 0x144   : > { %v2676_v44 = vadd.f32 %v860_v39, %v796_v20  ;;  %v734_v46 = vadd.f32 %v733_v24, %v669_v53  ;;  %v675_v20 = vadd.f32 %v2611_v38, %v2582_v22  ;;  %v678_v22 = vadd.f32 %v2611_v38, %v2601_v33 }
 0x145   : > { %v2679_v23 = vpop.f32.mrf.mxu0  ;;  %1057 = vmatmul.f32.gmra.mxu2 %v2203_v2  ;;  %v681_v33 = vadd.f32 %v2611_v38, %v2626_v49 }
 0x146   : > { %992 = vmatmul.f32.gmra.mxu1 %v2415_v25 }
 0x148   : > { %1122 = vmatmul.f32.gmra.mxu3 %v2441_v35  ;;  %1184 = vmatmul.f32.gmra.mxu0 %v2437_v34  ;;  %v798_v19 = vpop.f32.mrf.mxu2 }
 0x149   : > { %v799_v26 = vadd.f32 %v798_v19, %v734_v46 }
 0x14b   : > { %v736_v59 = vpop.f32.mrf.mxu1  ;;  %v863_v11 = vpop.f32.mrf.mxu3 }
 0x14c   : > { %v2686_v3 = vadd.f32 %v863_v11, %v799_v26  ;;  %v737_v2 = vadd.f32 %v736_v59, %v672_v7  ;;  %v684_v7 = vadd.f32 %v2611_v38, %v2573_v32  ;;  %v687_v32 = vadd.f32 %v2611_v38, %v2592_v30 }
 0x14d   : > { %v2690_v4 = vpop.f32.mrf.mxu0  ;;  %1060 = vmatmul.f32.gmra.mxu2 %v1496_v12 }
 0x14e   : > { %995 = vmatmul.f32.gmra.mxu1 %v2437_v34 }
 0x150   : > { %1125 = vmatmul.f32.gmra.mxu3 %v2463_v13  ;;  %1187 = vmatmul.f32.gmra.mxu0 %v2459_v40  ;;  %v801_v25 = vpop.f32.mrf.mxu2 }
 0x151   : > { %v802_v35 = vadd.f32 %v801_v25, %v737_v2  ;;  %v1500_v2 = vld [vmem:[%s1984_s5 + $0x90] sm:$0xff] }
 0x153   : > { %v739_v15 = vpop.f32.mrf.mxu1  ;;  %v866_v28 = vpop.f32.mrf.mxu3 }
 0x154   : > { %v2695_v10 = vadd.f32 %v866_v28, %v802_v35  ;;  %v740_v34 = vadd.f32 %v739_v15, %v675_v20  ;;  %v1501_v28 = vld [vmem:[%s1984_s5 + $0x98] sm:$0xff] }
 0x155   : > { %v2699_v6 = vpop.f32.mrf.mxu0  ;;  %1063 = vmatmul.f32.gmra.mxu2 %v2082_v27 }
 0x156   : > { %998 = vmatmul.f32.gmra.mxu1 %v2459_v40 }
 0x158   : > { %1128 = vmatmul.f32.gmra.mxu3 %v2485_v48  ;;  %1190 = vmatmul.f32.gmra.mxu0 %v2481_v47  ;;  %v804_v13 = vpop.f32.mrf.mxu2 }
 0x159   : > { %v805_v24 = vadd.f32 %v804_v13, %v740_v34 }
 0x15b   : > { %v742_v39 = vpop.f32.mrf.mxu1  ;;  %v869_v53 = vpop.f32.mrf.mxu3 }
 0x15c   : > { %v2705_v46 = vadd.f32 %v869_v53, %v805_v24  ;;  %v743_v27 = vadd.f32 %v742_v39, %v678_v22  ;;  %v1502_v22 = vld [vmem:[%s1984_s5 + $0xa8] sm:$0xff] }
 0x15d   : > { %v2709_v19 = vpop.f32.mrf.mxu0  ;;  %1066 = vmatmul.f32.gmra.mxu2 %v2139_v45 }
 0x15e   : > { %1001 = vmatmul.f32.gmra.mxu1 %v2481_v47 }
 0x160   : > { %1131 = vmatmul.f32.gmra.mxu3 %v2507_v55  ;;  %1193 = vmatmul.f32.gmra.mxu0 %v2503_v54  ;;  %v807_v40 = vpop.f32.mrf.mxu2 }
 0x161   : > { %v808_v48 = vadd.f32 %v807_v40, %v743_v27 }
 0x163   : > { %v745_v26 = vpop.f32.mrf.mxu1  ;;  %v872_v12 = vpop.f32.mrf.mxu3 }
 0x164   : > { %v2715_v59 = vadd.f32 %v872_v12, %v808_v48  ;;  %v746_v45 = vadd.f32 %v745_v26, %v681_v33 }
 0x165   : > { %v2719_v11 = vpop.f32.mrf.mxu0  ;;  %1069 = vmatmul.f32.gmra.mxu2 %v2200_v1 }
 0x166   : > { %1004 = vmatmul.f32.gmra.mxu1 %v2503_v54 }
 0x168   : > { %1134 = vmatmul.f32.gmra.mxu3 %v2529_v62  ;;  %1196 = vmatmul.f32.gmra.mxu0 %v2525_v61  ;;  %v810_v47 = vpop.f32.mrf.mxu2 }
 0x169   : > { %v811_v55 = vadd.f32 %v810_v47, %v746_v45 }
 0x16b   : > { %v748_v25 = vpop.f32.mrf.mxu1  ;;  %v875_v49 = vpop.f32.mrf.mxu3 }
 0x16c   : > { %v749_v35 = vadd.f32 %v748_v25, %v684_v7  ;;  %v2728_v15 = vadd.f32 %v875_v49, %v811_v55 }
 0x16d   : > { %v2730_v1 = vpop.f32.mrf.mxu0  ;;  %1072 = vmatmul.f32.gmra.mxu2 %v1500_v2  ;;  %v696_v2 = vadd.f32 %v2611_v38, %v2579_v21  ;;  %v699_v21 = vadd.f32 %v2611_v38, %v2599_v52  ;;  %v1506_v52 = vld [vmem:[%s1984_s5 + $0xd8] sm:$0xff] }
 0x16e   : > { %1007 = vmatmul.f32.gmra.mxu1 %v2525_v61 }
 0x170   : > { %1137 = vmatmul.f32.gmra.mxu3 %v2551_v16  ;;  %1199 = vmatmul.f32.gmra.mxu0 %v2547_v5  ;;  %v813_v54 = vpop.f32.mrf.mxu2 }
 0x171   : > { %v814_v62 = vadd.f32 %v813_v54, %v749_v35 }
 0x173   : > { %v751_v20 = vpop.f32.mrf.mxu1  ;;  %v878_v34 = vpop.f32.mrf.mxu3 }
 0x174   : > { %v752_v13 = vadd.f32 %v751_v20, %v687_v32  ;;  %v879_v24 = vadd.f32 %v878_v34, %v814_v62 }
 0x175   : > { %v943_v39 = vpop.f32.mrf.mxu0  ;;  %1075 = vmatmul.f32.gmra.mxu2 %v1501_v28 }
 0x176   : > { %v2738_v53 = vadd.f32 %v943_v39, %v879_v24  ;;  %1010 = vmatmul.f32.gmra.mxu1 %v2547_v5 }
 0x178   : > { %1140 = vmatmul.f32.gmra.mxu3 %v2577_v18  ;;  %1202 = vmatmul.f32.gmra.mxu0 %v2571_v17  ;;  %v816_v61 = vpop.f32.mrf.mxu2 }
 0x179   : > { %v817_v16 = vadd.f32 %v816_v61, %v752_v13 }
 0x17b   : > { %v754_v27 = vpop.f32.mrf.mxu1  ;;  %v881_v30 = vpop.f32.mrf.mxu3 }
 0x17c   : > { %v755_v40 = vadd.f32 %v754_v27, %v2621_v43  ;;  %v882_v48 = vadd.f32 %v881_v30, %v817_v16  ;;  %v1507_v30 = vld [vmem:[%s1984_s5 + $0xe0] sm:$0xff] }
 0x17d   : > { %v946_v26 = vpop.f32.mrf.mxu0  ;;  %1078 = vmatmul.f32.gmra.mxu2 %v1502_v22  ;;  %v1537_v22 = vld [vmem:[%s1984_s5 + $0xca] sm:$0xff] }
 0x17e   : > { %v2745_v12 = vadd.f32 %v946_v26, %v882_v48  ;;  %1013 = vmatmul.f32.gmra.mxu1 %v2571_v17 }
 0x180   : > { %1143 = vmatmul.f32.gmra.mxu3 %v2596_v31  ;;  %1205 = vmatmul.f32.gmra.mxu0 %v2590_v29  ;;  %v819_v5 = vpop.f32.mrf.mxu2 }
 0x181   : > { %v820_v18 = vadd.f32 %v819_v5, %v755_v40 }
 0x183   : > { %v757_v33 = vpop.f32.mrf.mxu1  ;;  %v884_v45 = vpop.f32.mrf.mxu3 }
 0x184   : > { %v758_v47 = vadd.f32 %v757_v33, %v2643_v60  ;;  %v885_v55 = vadd.f32 %v884_v45, %v820_v18  ;;  %v1523_v18 = vld [vmem:[%s1984_s5 + $0xe1] sm:$0xff] }
 0x185   : > { %v949_v7 = vpop.f32.mrf.mxu0  ;;  %1081 = vmatmul.f32.gmra.mxu2 %v2221_v8  ;;  %v1538_v33 = vld [vmem:[%s1984_s5 + $0xda] sm:$0xff] }
 0x186   : > { %v2752_v43 = vadd.f32 %v949_v7, %v885_v55  ;;  %1016 = vmatmul.f32.gmra.mxu1 %v2590_v29 }
 0x188   : > { %1146 = vmatmul.f32.gmra.mxu3 %v2618_v42  ;;  %1208 = vmatmul.f32.gmra.mxu0 %v2606_v37  ;;  %v822_v17 = vpop.f32.mrf.mxu2 }
 0x189   : > { %v823_v31 = vadd.f32 %v822_v17, %v758_v47 }
 0x18b   : > { %v760_v25 = vpop.f32.mrf.mxu1  ;;  %v887_v49 = vpop.f32.mrf.mxu3 }
 0x18c   : > { %v761_v60 = vadd.f32 %v760_v25, %v696_v2  ;;  %v888_v35 = vadd.f32 %v887_v49, %v823_v31  ;;  %v920_v2 = vadd.f32 %v2661_v63, %v2658_v58  ;;  %v1539_v25 = vld [vmem:[%s1984_s5 + $0xe2] sm:$0xff] }
 0x18d   : > { %v952_v54 = vpop.f32.mrf.mxu0  ;;  %1084 = vmatmul.f32.gmra.mxu2 %v2615_v41 }
 0x18e   : > { %v2760_v8 = vadd.f32 %v952_v54, %v888_v35  ;;  %1019 = vmatmul.f32.gmra.mxu1 %v2606_v37  ;;  %v1536_v37 = vld [vmem:[%s1984_s5 + $0xc2] sm:$0xff] }
 0x190   : > { %1149 = vmatmul.f32.gmra.mxu3 %v2639_v57  ;;  %1211 = vmatmul.f32.gmra.mxu0 %v2632_v51  ;;  %v825_v29 = vpop.f32.mrf.mxu2 }
 0x191   : > { %v826_v42 = vadd.f32 %v825_v29, %v761_v60 }
 0x193   : > { %v763_v62 = vpop.f32.mrf.mxu1  ;;  %v890_v32 = vpop.f32.mrf.mxu3 }
 0x194   : > { %v764_v28 = vadd.f32 %v763_v62, %v699_v21  ;;  %v891_v20 = vadd.f32 %v890_v32, %v826_v42  ;;  %v923_v62 = vadd.f32 %v2670_v36, %v2667_v14 }
 0x195   : > { %v955_v34 = vpop.f32.mrf.mxu0  ;;  %1087 = vmatmul.f32.gmra.mxu2 %v2636_v56  ;;  %v1522_v56 = vld [vmem:[%s1984_s5 + $0xd9] sm:$0xff]  ;;  %s1541_s5 = sshll.u32 %s1750_s15, 4 }
 0x196   : > { %v2769_v41 = vadd.f32 %v955_v34, %v891_v20  ;;  %1022 = vmatmul.f32.gmra.mxu1 %v2632_v51  ;;  %s1271_s21 = sadd.s32 %s1542_s29, %s1541_s5  ;;  %s1690_s5 = scalar_lea.hbm %s2877_s3, 512 }
 0x197   : > { %s1543_s10 = sshll.u32 %s1271_s21, 3 }
 0x198   : > { %1152 = vmatmul.f32.gmra.mxu3 %v2653_v9  ;;  %1214 = vmatmul.f32.gmra.mxu0 %v1536_v37  ;;  %v828_v57 = vpop.f32.mrf.mxu2  ;;  %s1273_s16 = scalar_lea.hbm %s2877_s3, %s1543_s10 }
 0x199   : > { %v829_v13 = vadd.f32 %v828_v57, %v764_v28  ;;  %s1276_s28 = sshll.u32 %s1273_s16, 4  ;;  %s1277_s28 = int_to_ptr.hbm [resolvable:$true] %s1276_s28 }
 0x19a   : > { %s1684_s7 = sshra.s32 %s1277_s28, 4  ;;  %s1685_s7 = int_to_ptr.hbm [resolvable:$true] %s1684_s7 }
 0x19b   : > { %v766_v38 = vpop.f32.mrf.mxu1  ;;  %v893_v24 = vpop.f32.mrf.mxu3  ;;  %s1686_s8 = scalar_lea.hbm %s1685_s7, 128  ;;  %p1691_p6 = scmp.lt.s32.totalorder %s1685_s7, %s2877_s3 }
 0x19c   : > { %v767_v39 = vadd.f32 %v766_v38, %v2629_v50  ;;  %v894_v61 = vadd.f32 %v893_v24, %v829_v13  ;;  %p1687_p2 = scmp.ne.s32.totalorder %s1685_s7, %s1686_s8  ;;  %p1692_p7 = scmp.lt.s32.totalorder %s1690_s5, %s1686_s8 }
 0x19d   : > { %v958_v16 = vpop.f32.mrf.mxu0  ;;  %1090 = vmatmul.f32.gmra.mxu2 %v1506_v52  ;;  %v926_v52 = vadd.f32 %v2679_v23, %v2676_v44 }
 0x19e   : > { %v2777_v27 = vadd.f32 %v958_v16, %v894_v61  ;;  %1025 = vmatmul.f32.gmra.mxu1 %v1536_v37  ;;  %p1688_p4 = pnand %p1687_p2, %p1841_p3  ;;  %p1693_p9 = por %p1692_p7, %p1691_p6 }
 0x1a0   : > { %1155 = vmatmul.f32.gmra.mxu3 %v1522_v56  ;;  %1217 = vmatmul.f32.gmra.mxu0 %v1537_v22  ;;  %v831_v51 = vpop.f32.mrf.mxu2  ;;  %p1689_p5 = pneg %p1688_p4 }
 0x1a1   : > { %v832_v9 = vadd.f32 %v831_v51, %v767_v39  ;;  %v929_v51 = vadd.f32 %v2690_v4, %v2686_v3 }
 0x1a2   : > { %p1694_p10 = pnand %p1693_p9, %p1689_p5 }
 0x1a3   : > { %v769_v40 = vpop.f32.mrf.mxu1  ;;  %v896_v48 = vpop.f32.mrf.mxu3 }
 0x1a4   : > { %v770_v26 = vadd.f32 %v769_v40, %v2648_v0  ;;  %v897_v50 = vadd.f32 %v896_v48, %v832_v9 }
 0x1a5   : > { %v961_v5 = vpop.f32.mrf.mxu0  ;;  %1093 = vmatmul.f32.gmra.mxu2 %v1507_v30 }
 0x1a6   : > { %v2783_v45 = vadd.f32 %v961_v5, %v897_v50  ;;  %1028 = vmatmul.f32.gmra.mxu1 %v1537_v22 }
 0x1a8   : > { %1158 = vmatmul.f32.gmra.mxu3 %v1523_v18  ;;  %1220 = vmatmul.f32.gmra.mxu0 %v1538_v33  ;;  %v834_v47 = vpop.f32.mrf.mxu2  ;;  %v932_v18 = vadd.f32 %v2699_v6, %v2695_v10 }
 0x1a9   : > { %v835_v55 = vadd.f32 %v834_v47, %v770_v26 }
 0x1ab   : > { %v899_v7 = vpop.f32.mrf.mxu3  ;;  %v984_v17 = vpop.f32.mrf.mxu1 }
 0x1ac   : > { %v900_v31 = vadd.f32 %v899_v7, %v835_v55  ;;  %v985_v60 = vadd.f32 %v984_v17, %v920_v2 }
 0x1ad   : > { %v964_v0 = vpop.f32.mrf.mxu0 }
 0x1ae   : > { %v2788_v49 = vadd.f32 %v964_v0, %v900_v31  ;;  %v935_v0 = vadd.f32 %v2709_v19, %v2705_v46 }
 0x1b0   : > { %1223 = vmatmul.f32.gmra.mxu0 %v1539_v25  ;;  %v1049_v35 = vpop.f32.mrf.mxu2 }
 0x1b1   : > { %v1050_v54 = vadd.f32 %v1049_v35, %v985_v60 }
 0x1b3   : > { %v987_v29 = vpop.f32.mrf.mxu1  ;;  %v1114_v42 = vpop.f32.mrf.mxu3 }
 0x1b4   : > { %v1115_v21 = vadd.f32 %v1114_v42, %v1050_v54  ;;  %v988_v20 = vadd.f32 %v987_v29, %v923_v62  ;;  %v938_v62 = vadd.f32 %v2719_v11, %v2715_v59 }
 0x1b5   : > { %v1179_v32 = vpop.f32.mrf.mxu0 }
 0x1b6   : > { %v1180_v28 = vadd.f32 %v1179_v32, %v1115_v21 }
 0x1b8   : > { %v1227_v58 = vmax.f32 %v1180_v28, 0.0  ;;  %v1052_v63 = vpop.f32.mrf.mxu2 }
 0x1b9   : > { %v1053_v34 = vadd.f32 %v1052_v63, %v988_v20 }
 0x1ba   : > { %1243 = vst [vmem:[%s1869_s11] sm:$0xff] %v1227_v58 }
 0x1bb   : > { %v990_v37 = vpop.f32.mrf.mxu1  ;;  %v1117_v57 = vpop.f32.mrf.mxu3 }
 0x1bc   : > { %v1118_v13 = vadd.f32 %v1117_v57, %v1053_v34  ;;  %v991_v39 = vadd.f32 %v990_v37, %v926_v52  ;;  %v941_v57 = vadd.f32 %v2730_v1, %v2728_v15 }
 0x1bd   : > { %v1182_v38 = vpop.f32.mrf.mxu0 }
 0x1be   : > { %v1183_v24 = vadd.f32 %v1182_v38, %v1118_v13 }
 0x1c0   : > { %v1228_v61 = vmax.f32 %v1183_v24, 0.0  ;;  %v1055_v14 = vpop.f32.mrf.mxu2 }
 0x1c1   : > { %v1056_v36 = vadd.f32 %v1055_v14, %v991_v39 }
 0x1c2   : > { %1244 = vst [vmem:[%s1869_s11 + $0x8] sm:$0xff] %v1228_v61 }
 0x1c3   : > { %v993_v16 = vpop.f32.mrf.mxu1  ;;  %v1120_v56 = vpop.f32.mrf.mxu3 }
 0x1c4   : > { %v1121_v22 = vadd.f32 %v1120_v56, %v1056_v36  ;;  %v994_v40 = vadd.f32 %v993_v16, %v929_v51 }
 0x1c5   : > { %v1185_v9 = vpop.f32.mrf.mxu0 }
 0x1c6   : > { %v1186_v30 = vadd.f32 %v1185_v9, %v1121_v22 }
 0x1c8   : > { %v1229_v48 = vmax.f32 %v1186_v30, 0.0  ;;  %v1058_v44 = vpop.f32.mrf.mxu2 }
 0x1c9   : > { %v1059_v23 = vadd.f32 %v1058_v44, %v994_v40 }
 0x1ca   : > { %1245 = vst [vmem:[%s1869_s11 + $0x10] sm:$0xff] %v1229_v48 }
 0x1cb   : > { %v996_v26 = vpop.f32.mrf.mxu1  ;;  %v1123_v50 = vpop.f32.mrf.mxu3 }
 0x1cc   : > { %v1124_v5 = vadd.f32 %v1123_v50, %v1059_v23  ;;  %v997_v55 = vadd.f32 %v996_v26, %v932_v18 }
 0x1cd   : > { %v1188_v33 = vpop.f32.mrf.mxu0 }
 0x1ce   : > { %v1189_v47 = vadd.f32 %v1188_v33, %v1124_v5 }
 0x1d0   : > { %v1230_v7 = vmax.f32 %v1189_v47, 0.0  ;;  %v1061_v3 = vpop.f32.mrf.mxu2 }
 0x1d1   : > { %v1062_v4 = vadd.f32 %v1061_v3, %v997_v55 }
 0x1d2   : > { %1246 = vst [vmem:[%s1869_s11 + $0x18] sm:$0xff] %v1230_v7 }
 0x1d3   : > { %v999_v17 = vpop.f32.mrf.mxu1  ;;  %v1126_v31 = vpop.f32.mrf.mxu3 }
 0x1d4   : > { %v1127_v2 = vadd.f32 %v1126_v31, %v1062_v4  ;;  %v1000_v35 = vadd.f32 %v999_v17, %v935_v0 }
 0x1d5   : > { %v1191_v25 = vpop.f32.mrf.mxu0 }
 0x1d6   : > { %v1192_v60 = vadd.f32 %v1191_v25, %v1127_v2 }
 0x1d8   : > { %v1231_v54 = vmax.f32 %v1192_v60, 0.0  ;;  %v1064_v10 = vpop.f32.mrf.mxu2 }
 0x1d9   : > { %v1065_v6 = vadd.f32 %v1064_v10, %v1000_v35 }
 0x1da   : > { %1247 = vst [vmem:[%s1869_s11 + $0x20] sm:$0xff] %v1231_v54 }
 0x1db   : > { %v1002_v29 = vpop.f32.mrf.mxu1  ;;  %v1129_v42 = vpop.f32.mrf.mxu3 }
 0x1dc   : > { %v1130_v21 = vadd.f32 %v1129_v42, %v1065_v6  ;;  %v1003_v20 = vadd.f32 %v1002_v29, %v938_v62 }
 0x1dd   : > { %v1194_v32 = vpop.f32.mrf.mxu0 }
 0x1de   : > { %v1195_v28 = vadd.f32 %v1194_v32, %v1130_v21 }
 0x1e0   : > { %v1232_v58 = vmax.f32 %v1195_v28, 0.0  ;;  %v1067_v46 = vpop.f32.mrf.mxu2 }
 0x1e1   : > { %v1068_v19 = vadd.f32 %v1067_v46, %v1003_v20 }
 0x1e2   : > { %1248 = vst [vmem:[%s1869_s11 + $0x28] sm:$0xff] %v1232_v58 }
 0x1e3   : > { %v1005_v63 = vpop.f32.mrf.mxu1  ;;  %v1132_v34 = vpop.f32.mrf.mxu3 }
 0x1e4   : > { %v1133_v37 = vadd.f32 %v1132_v34, %v1068_v19  ;;  %v1006_v38 = vadd.f32 %v1005_v63, %v941_v57 }
 0x1e5   : > { %v1197_v13 = vpop.f32.mrf.mxu0 }
 0x1e6   : > { %v1198_v52 = vadd.f32 %v1197_v13, %v1133_v37 }
 0x1e8   : > { %v1233_v24 = vmax.f32 %v1198_v52, 0.0  ;;  %v1070_v59 = vpop.f32.mrf.mxu2 }
 0x1e9   : > { %v1071_v11 = vadd.f32 %v1070_v59, %v1006_v38 }
 0x1ea   : > { %1249 = vst [vmem:[%s1869_s11 + $0x30] sm:$0xff] %v1233_v24 }
 0x1eb   : > { %v1008_v39 = vpop.f32.mrf.mxu1  ;;  %v1135_v61 = vpop.f32.mrf.mxu3 }
 0x1ec   : > { %v1136_v14 = vadd.f32 %v1135_v61, %v1071_v11  ;;  %v1009_v56 = vadd.f32 %v1008_v39, %v2738_v53 }
 0x1ed   : > { %v1200_v36 = vpop.f32.mrf.mxu0 }
 0x1ee   : > { %v1201_v16 = vadd.f32 %v1200_v36, %v1136_v14 }
 0x1f0   : > { %v1234_v22 = vmax.f32 %v1201_v16, 0.0  ;;  %v1073_v51 = vpop.f32.mrf.mxu2 }
 0x1f1   : > { %v1074_v9 = vadd.f32 %v1073_v51, %v1009_v56 }
 0x1f2   : > { %1250 = vst [vmem:[%s1869_s11 + $0x38] sm:$0xff] %v1234_v22 }
 0x1f3   : > { %v1011_v15 = vpop.f32.mrf.mxu1  ;;  %v1138_v1 = vpop.f32.mrf.mxu3 }
 0x1f4   : > { %v1139_v30 = vadd.f32 %v1138_v1, %v1074_v9  ;;  %v1012_v44 = vadd.f32 %v1011_v15, %v2745_v12 }
 0x1f5   : > { %v1203_v40 = vpop.f32.mrf.mxu0 }
 0x1f6   : > { %v1204_v48 = vadd.f32 %v1203_v40, %v1139_v30 }
 0x1f8   : > { %v1235_v23 = vmax.f32 %v1204_v48, 0.0  ;;  %v1076_v26 = vpop.f32.mrf.mxu2 }
 0x1f9   : > { %v1077_v50 = vadd.f32 %v1076_v26, %v1012_v44 }
 0x1fa   : > { %1251 = vst [vmem:[%s1869_s11 + $0x40] sm:$0xff] %v1235_v23 }
 0x1fb   : > { %v1014_v5 = vpop.f32.mrf.mxu1  ;;  %v1141_v18 = vpop.f32.mrf.mxu3 }
 0x1fc   : > { %v1142_v33 = vadd.f32 %v1141_v18, %v1077_v50  ;;  %v1015_v55 = vadd.f32 %v1014_v5, %v2752_v43 }
 0x1fd   : > { %v1206_v53 = vpop.f32.mrf.mxu0 }
 0x1fe   : > { %v1207_v47 = vadd.f32 %v1206_v53, %v1142_v33 }
 0x200   : > { %v1236_v7 = vmax.f32 %v1207_v47, 0.0  ;;  %v1079_v3 = vpop.f32.mrf.mxu2 }
 0x201   : > { %v1080_v4 = vadd.f32 %v1079_v3, %v1015_v55 }
 0x202   : > { %1252 = vst [vmem:[%s1869_s11 + $0x48] sm:$0xff] %v1236_v7 }
 0x203   : > { %v1017_v17 = vpop.f32.mrf.mxu1  ;;  %v1144_v31 = vpop.f32.mrf.mxu3 }
 0x204   : > { %v1145_v2 = vadd.f32 %v1144_v31, %v1080_v4  ;;  %v1018_v25 = vadd.f32 %v1017_v17, %v2760_v8 }
 0x205   : > { %v1209_v12 = vpop.f32.mrf.mxu0 }
 0x206   : > { %v1210_v0 = vadd.f32 %v1209_v12, %v1145_v2 }
 0x208   : > { %v1237_v60 = vmax.f32 %v1210_v0, 0.0  ;;  %v1082_v35 = vpop.f32.mrf.mxu2 }
 0x209   : > { %v1083_v54 = vadd.f32 %v1082_v35, %v1018_v25 }
 0x20a   : > { %1253 = vst [vmem:[%s1869_s11 + $0x50] sm:$0xff] %v1237_v60 }
 0x20b   : > { %v1020_v10 = vpop.f32.mrf.mxu1  ;;  %v1147_v6 = vpop.f32.mrf.mxu3 }
 0x20c   : > { %v1148_v29 = vadd.f32 %v1147_v6, %v1083_v54  ;;  %v1021_v21 = vadd.f32 %v1020_v10, %v2769_v41 }
 0x20d   : > { %v1212_v43 = vpop.f32.mrf.mxu0 }
 0x20e   : > { %v1213_v42 = vadd.f32 %v1212_v43, %v1148_v29 }
 0x210   : > { %v1238_v62 = vmax.f32 %v1213_v42, 0.0  ;;  %v1085_v32 = vpop.f32.mrf.mxu2 }
 0x211   : > { %v1086_v28 = vadd.f32 %v1085_v32, %v1021_v21 }
 0x212   : > { %1254 = vst [vmem:[%s1869_s11 + $0x58] sm:$0xff] %v1238_v62 }
 0x213   : > { %v1023_v20 = vpop.f32.mrf.mxu1  ;;  %v1150_v58 = vpop.f32.mrf.mxu3 }
 0x214   : > { %v1151_v46 = vadd.f32 %v1150_v58, %v1086_v28  ;;  %v1024_v63 = vadd.f32 %v1023_v20, %v2777_v27 }
 0x215   : > { %v1215_v8 = vpop.f32.mrf.mxu0 }
 0x216   : > { %v1216_v19 = vadd.f32 %v1215_v8, %v1151_v46 }
 0x218   : > { %v1239_v34 = vmax.f32 %v1216_v19, 0.0  ;;  %v1088_v37 = vpop.f32.mrf.mxu2 }
 0x219   : > { %v1089_v57 = vadd.f32 %v1088_v37, %v1024_v63 }
 0x21a   : > { %1255 = vst [vmem:[%s1869_s11 + $0x60] sm:$0xff] %v1239_v34 }
 0x21b   : > { %v1026_v13 = vpop.f32.mrf.mxu1  ;;  %v1153_v41 = vpop.f32.mrf.mxu3 }
 0x21c   : > { %v1154_v52 = vadd.f32 %v1153_v41, %v1089_v57  ;;  %v1027_v59 = vadd.f32 %v1026_v13, %v2783_v45 }
 0x21d   : > { %v1218_v38 = vpop.f32.mrf.mxu0 }
 0x21e   : > { %v1219_v24 = vadd.f32 %v1218_v38, %v1154_v52 }
 0x220   : > { %v1240_v11 = vmax.f32 %v1219_v24, 0.0  ;;  %v1091_v39 = vpop.f32.mrf.mxu2 }
 0x221   : > { %v1092_v61 = vadd.f32 %v1091_v39, %v1027_v59 }
 0x222   : > { %1256 = vst [vmem:[%s1869_s11 + $0x68] sm:$0xff] %v1240_v11 }
 0x223   : > { %v1156_v27 = vpop.f32.mrf.mxu3  ;;  %v1029_v14 = vpop.f32.mrf.mxu1 }
 0x224   : > { %v1157_v36 = vadd.f32 %v1156_v27, %v1092_v61  ;;  %v1030_v22 = vadd.f32 %v1029_v14, %v2788_v49 }
 0x225   : > { %v1221_v16 = vpop.f32.mrf.mxu0 }
 0x226   : > { %v1222_v56 = vadd.f32 %v1221_v16, %v1157_v36 }
 0x228   : > { %v1241_v45 = vmax.f32 %v1222_v56, 0.0  ;;  %v1094_v51 = vpop.f32.mrf.mxu2 }
 0x229   : > { %v1095_v9 = vadd.f32 %v1094_v51, %v1030_v22 }
 0x22a   : > { %1257 = vst [vmem:[%s1869_s11 + $0x70] sm:$0xff] %v1241_v45 }
 0x22b   : > { %v1159_v15 = vpop.f32.mrf.mxu3 }
 0x22c   : > { %v1160_v1 = vadd.f32 %v1159_v15, %v1095_v9 }
 0x22d   : > { %v1224_v30 = vpop.f32.mrf.mxu0 }
 0x22e   : > { %v1225_v40 = vadd.f32 %v1224_v30, %v1160_v1 }
 0x230   : > { %v1242_v48 = vmax.f32 %v1225_v40, 0.0 }
 0x232   : > { %1258 = vst [vmem:[%s1869_s11 + $0x78] sm:$0xff] %v1242_v48 }
 0x233   : > { %1697 = shalt.err (!%p1694_p10)
}
 0x234   : > { %s1768_s4 = smov 128   ;;  %s1769_s11 = smov 8  }
 0x235   : > { %1596 = dma.vmem_to_hbm [thread:$0]  (%p1841_p3), %s1275_s27, 2048, %s1277_s28, %s1260_s6, %s1768_s4, %s1768_s4, %s1769_s11  }
 0x236 PF: > { %p1602_p11 = scmp.ge.s32.totalorder %s1766_s19, 2  ;;  %s1291_s10 = sand.u32 1, %s1738_s12  }
 0x237   : > { %s1292_s15 = scalar_lea.sflag [#allocation5], %s1291_s10 }
 0x238   : > { %p1599_p12 = pnand %p1602_p11, %p1850_p8 }
 0x23a   : > { %p1600_p13 = pneg %p1599_p12 }
 0x23c   : > { %1733 = dma.done.wait (%p1600_p13), %s1292_s15, 2048  }
 0x23d   : > { %1735 = vsyncadd (%p1600_p13), %s1292_s15, 4294965248  ;;  %s16_s19 = sadd.s32 1, %s1766_s19   ;;  %s2880_s12 = smov %s1742_s13 }
 0x23e   : > { %p13_p0 = scmp.ge.s32.totalorder %s16_s19, 6   ;;  %s2881_s13 = smov %s1746_s14 }
 0x23f   : > { %s2882_s14 = smov %s1859_s30  ;;  %s2883_s15 = smov %s1758_s17 }
 0x240   : > { %s2884_s16 = smov %s1762_s18  ;;  %s2885_s17 = smov %s2888_s22 }
 0x241   : > { %s2886_s18 = smov %s2892_s23  ;;  %15 = sbr.rel (!%p13_p0) target bundleno = 5 (0x5), region = 141 }
 0x246   :  { %1298 = vsyncpa [#allocation5], 1 }
 0x247   :  { %1300 = vsyncpa [#allocation5 + $0x1], 1 }
 0x248   :  { %1301 = vsyncmov [#allocation3] }
 0x24b   :  { %s1302_s25 = vpop.sfrf %1301 }
 0x24c   :  { %p1546_p3 = scmp.ne.s32.totalorder %s1302_s25, 0 }
 0x24e   :  { %1306 = shalt.err (%p1546_p3)  }
 0x24f   :  { %1308 = vsyncmov [#allocation3 + $0x1] }
 0x252   :  { %s1309_s26 = vpop.sfrf %1308 }
 0x253   :  { %p1547_p8 = scmp.ne.s32.totalorder %s1309_s26, 0 }
 0x255   :  { %1313 = shalt.err (%p1547_p8)  }

</bundles_post_ra>
